<compile_context>
chip_gen: v7x
topology: tpu7x:2x2x1
jax: 0.10.0
libtpu: 0.0.40
codegen_flags: <defaults>
</compile_context>

<pallas_src>
import math
from functools import partial

import jax
import jax.numpy as jnp
from jax.experimental import pallas as pl
from jax.experimental.pallas import tpu as pltpu

EPS = 1e-5
_VMEM_LIMIT = 48 * 1024 * 1024   # safe on v7x (64 MiB phys) and v5e/v6e (128 MiB)


def _round_up(n, q):
    return ((n + q - 1) // q) * q


def _pick_tile(n, target, quantum=128):
    """Largest multiple of `quantum` that divides n and is <= target (else n)."""
    if n % quantum:
        return n
    t = (min(target, n) // quantum) * quantum
    while t > 0 and n % t:
        t -= quantum
    return t if t > 0 else n


# --------------------------------------------------------------------------
# Kernel 1: complex conv as one stacked im2col matmul (lane-dense output).
#   rows [0, Cp)     -> real = W_re@Pr - W_im@Pi + (b_re - b_im)
#   rows [Cp, 2Cp)   -> imag = W_im@Pr + W_re@Pi + (b_re + b_im)
# --------------------------------------------------------------------------
def _cconv_matmul_kernel(p_ref, w_ref, b_ref, o_ref):
    # p_ref: (2*Kp, TM) bf16 stacked [Pr; Pi] patch tile
    # w_ref: (2*Cp, 2*Kp) bf16 stacked complex weight
    # b_ref: (2*Cp, 1) f32 folded biases
    o_ref[...] = jnp.dot(w_ref[...], p_ref[...],
                         preferred_element_type=jnp.float32) + b_ref[...]


# --------------------------------------------------------------------------
# Kernel 2: fused complex batch-norm (train mode, batch statistics, 2x2
# covariance whitening as in "Deep Complex Networks") + PReLU.
# Blocks are (2*Cp, B, T); statistics reduce over the batch axis (axis=1)
# only, so tiling the trailing ho*wo axis is exact.
# --------------------------------------------------------------------------
def _cbn_prelu_kernel(x_ref, grr_ref, gri_ref, gii_ref, betar_ref, betai_ref,
                      a_ref, o_ref):
    coutp = grr_ref.shape[0]
    x = x_ref[...]
    xr = x[:coutp]            # sublane-tile aligned split (Cp % 8 == 0)
    xi = x[coutp:]

    mu_r = jnp.mean(xr, axis=1, keepdims=True)
    mu_i = jnp.mean(xi, axis=1, keepdims=True)
    rc = xr - mu_r
    ic = xi - mu_i
    vrr = jnp.mean(rc * rc, axis=1, keepdims=True) + EPS
    vii = jnp.mean(ic * ic, axis=1, keepdims=True) + EPS
    vri = jnp.mean(rc * ic, axis=1, keepdims=True)

    tau = vrr + vii
    delta = jnp.maximum(vrr * vii - vri * vri, 1e-12)   # keep sqrt real
    s = jnp.sqrt(delta)
    t = jnp.sqrt(tau + 2.0 * s)
    inv_st = pl.reciprocal(s * t, approx=True)          # EUP slot, ~free
    wrr = (vii + s) * inv_st
    wii = (vrr + s) * inv_st
    wri = -vri * inv_st

    n_r = wrr * rc + wri * ic
    n_i = wri * rc + wii * ic

    bn_r = grr_ref[...] * n_r + gri_ref[...] * n_i + betar_ref[...]
    bn_i = gri_ref[...] * n_r + gii_ref[...] * n_i + betai_ref[...]

    a = a_ref[0]   # shared PReLU slope (nn.PReLU() default: single parameter)
    out_r = jnp.where(bn_r >= 0.0, bn_r, a * bn_r)
    out_i = jnp.where(bn_i >= 0.0, bn_i, a * bn_i)
    o_ref[...] = jnp.concatenate([out_r, out_i], axis=0)


# --------------------------------------------------------------------------
# Glue (plain JAX): transposed im2col + parameter packing.
# --------------------------------------------------------------------------
def _im2col_t(x, kh, kw, sh, sw, ph, pw):
    """x: (B, C, H, W) -> (C*kh*kw, B*ho*wo) transposed patch matrix.

    K ordered (C, kh, kw) to match the PyTorch (C_out, C_in, kh, kw) weight
    flatten; M ordered (B, ho, wo).
    """
    # TODO(synk): XLA materializes the kh*kw-inflated patch matrix in HBM; on
    # HBM-BW-limited parts (v5e) the patch gather should move inside the
    # kernel via manual DMA of (C, kh, tile+kw) windows from a pl.ANY input.
    x = jnp.pad(x, ((0, 0), (0, 0), (ph, ph), (pw, pw)))
    B, C, H, W = x.shape
    ho = (H - kh) // sh + 1
    wo = (W - kw) // sw + 1
    cols = []
    for i in range(kh):
        for j in range(kw):
            cols.append(x[:, :, i:i + sh * ho:sh, j:j + sw * wo:sw])
    p = jnp.stack(cols, axis=2)                  # (B, C, kh*kw, ho, wo)
    p = p.transpose(1, 2, 0, 3, 4)               # (C, kh*kw, B, ho, wo)
    return p.reshape(C * kh * kw, B * ho * wo), ho, wo


def encoder_forward(x, params, kernel_size, stride, padding, train=True,
                    conv_tile=512, bn_tile=2048):
    """x: (B, C_in, H, W, 2) float32. Returns (B, C_out, H_out, W_out, 2)."""
    # TODO(synk): only the train=True branch (batch statistics) of
    # ComplexBatchNormal is implemented; the running-stats eval branch is not.
    assert train
    kh, kw = kernel_size
    sh, sw = stride
    ph, pw = padding

    xr, xi = x[..., 0], x[..., 1]
    B, cin, H, W = xr.shape
    cout = params["w_re"].shape[0]
    coutp = _round_up(cout, 8)                              # sublane-align C_out

    pr_t, ho, wo = _im2col_t(xr, kh, kw, sh, sw, ph, pw)    # (K, M)
    pi_t, _, _ = _im2col_t(xi, kh, kw, sh, sw, ph, pw)
    K = cin * kh * kw
    M = B * ho * wo
    Kp = _round_up(K, 8)                                    # sublane-align K

    pad_k = ((0, Kp - K), (0, 0))
    p_stack = jnp.concatenate(
        [jnp.pad(pr_t, pad_k), jnp.pad(pi_t, pad_k)], axis=0
    ).astype(jnp.bfloat16)                                  # (2*Kp, M)

    pad_ck = ((0, coutp - cout), (0, Kp - K))
    wr = jnp.pad(params["w_re"].reshape(cout, K), pad_ck)
    wi = jnp.pad(params["w_im"].reshape(cout, K), pad_ck)
    w_stack = jnp.concatenate(
        [jnp.concatenate([wr, -wi], axis=1),
         jnp.concatenate([wi, wr], axis=1)], axis=0).astype(jnp.bfloat16)  # (2Cp,2Kp)
    pad_c1 = ((0, coutp - cout), (0, 0))
    b_r = jnp.pad((params["b_re"] - params["b_im"]).reshape(cout, 1), pad_c1)
    b_i = jnp.pad((params["b_re"] + params["b_im"]).reshape(cout, 1), pad_c1)
    b_stack = jnp.concatenate([b_r, b_i], axis=0).astype(jnp.float32)      # (2Cp,1)

    tm = _pick_tile(M, conv_tile)
    conv_out = pl.pallas_call(
        _cconv_matmul_kernel,
        out_shape=jax.ShapeDtypeStruct((2 * coutp, M), jnp.float32),
        grid_spec=pltpu.PrefetchScalarGridSpec(
            num_scalar_prefetch=0,
            grid=(M // tm,),
            in_specs=[
                pl.BlockSpec((2 * Kp, tm), lambda i: (0, i)),
                pl.BlockSpec((2 * coutp, 2 * Kp), lambda i: (0, 0)),
                pl.BlockSpec((2 * coutp, 1), lambda i: (0, 0)),
            ],
            out_specs=pl.BlockSpec((2 * coutp, tm), lambda i: (0, i))),
        compiler_params=pltpu.CompilerParams(
            dimension_semantics=("parallel",),
            vmem_limit_bytes=_VMEM_LIMIT),
    )(p_stack, w_stack, b_stack)

    # (2Cp, M) -> (2Cp, B, ho*wo): pure reshape, no transpose between kernels.
    how = ho * wo
    x3 = conv_out.reshape(2 * coutp, B, how)

    pad_c3 = ((0, coutp - cout), (0, 0), (0, 0))
    grr = jnp.pad(params["gamma_rr"].reshape(cout, 1, how), pad_c3)
    gri = jnp.pad(params["gamma_ri"].reshape(cout, 1, how), pad_c3)
    gii = jnp.pad(params["gamma_ii"].reshape(cout, 1, how), pad_c3)
    betar = jnp.pad(params["beta_r"].reshape(cout, 1, how), pad_c3)
    betai = jnp.pad(params["beta_i"].reshape(cout, 1, how), pad_c3)

    t_hw = _pick_tile(how, bn_tile)
    x_spec = pl.BlockSpec((2 * coutp, B, t_hw), lambda i: (0, 0, i))
    p_spec = pl.BlockSpec((coutp, 1, t_hw), lambda i: (0, 0, i))
    smem = pl.BlockSpec(memory_space=pltpu.MemorySpace.SMEM)

    # TODO(synk): B=4 fills only half of the 8 sublanes in the BN vregs;
    # padding the batch to 8 would require masked statistics.
    bn_out = pl.pallas_call(
        _cbn_prelu_kernel,
        out_shape=jax.ShapeDtypeStruct((2 * coutp, B, how), jnp.float32),
        grid_spec=pltpu.PrefetchScalarGridSpec(
            num_scalar_prefetch=0,
            grid=(how // t_hw,),
            in_specs=[x_spec, p_spec, p_spec, p_spec, p_spec, p_spec, smem],
            out_specs=x_spec),
        compiler_params=pltpu.CompilerParams(
            dimension_semantics=("parallel",),
            vmem_limit_bytes=_VMEM_LIMIT),
    )(x3, grr, gri, gii, betar, betai,
      params["prelu_a"].reshape(1).astype(jnp.float32))

    # single final slice/transpose back to the module's NCHW output layout
    out_r = bn_out[:cout].reshape(cout, B, ho, wo).transpose(1, 0, 2, 3)
    out_i = bn_out[coutp:coutp + cout].reshape(cout, B, ho, wo).transpose(1, 0, 2, 3)
    return jnp.stack((out_r, out_i), axis=-1)


# --------------------------------------------------------------------------
# Pure-JAX reference (independent path via lax.conv) for a sanity check.
# --------------------------------------------------------------------------
def _conv2d_ref(x, w, b, stride, padding):
    out = jax.lax.conv_general_dilated(
        x, w, window_strides=stride,
        padding=[(padding[0], padding[0]), (padding[1], padding[1])],
        dimension_numbers=("NCHW", "OIHW", "NCHW"),
        precision=jax.lax.Precision.HIGHEST)
    return out + b[None, :, None, None]


def encoder_reference(x, params, kernel_size, stride, padding):
    del kernel_size
    xr, xi = x[..., 0], x[..., 1]
    rr = _conv2d_ref(xr, params["w_re"], params["b_re"], stride, padding)
    ii = _conv2d_ref(xi, params["w_im"], params["b_im"], stride, padding)
    ir = _conv2d_ref(xi, params["w_re"], params["b_re"], stride, padding)
    ri = _conv2d_ref(xr, params["w_im"], params["b_im"], stride, padding)
    cr, ci = rr - ii, ir + ri

    mu_r = cr.mean(0, keepdims=True)
    mu_i = ci.mean(0, keepdims=True)
    rc, ic = cr - mu_r, ci - mu_i
    vrr = (rc * rc).mean(0, keepdims=True) + EPS
    vii = (ic * ic).mean(0, keepdims=True) + EPS
    vri = (rc * ic).mean(0, keepdims=True)
    s = jnp.sqrt(jnp.maximum(vrr * vii - vri * vri, 1e-12))
    t = jnp.sqrt(vrr + vii + 2.0 * s)
    inv_st = 1.0 / (s * t)
    wrr, wii, wri = (vii + s) * inv_st, (vrr + s) * inv_st, -vri * inv_st
    n_r = wrr * rc + wri * ic
    n_i = wri * rc + wii * ic
    g_rr = params["gamma_rr"][None]
    g_ri = params["gamma_ri"][None]
    g_ii = params["gamma_ii"][None]
    bn_r = g_rr * n_r + g_ri * n_i + params["beta_r"][None]
    bn_i = g_ri * n_r + g_ii * n_i + params["beta_i"][None]
    a = params["prelu_a"][0]
    out_r = jnp.where(bn_r >= 0, bn_r, a * bn_r)
    out_i = jnp.where(bn_i >= 0, bn_i, a * bn_i)
    return jnp.stack((out_r, out_i), axis=-1)


if __name__ == "__main__":
    # Encoder(in_channel=2, out_channel=4, kernel_size=(3,3), stride=(2,1),
    #         chw=(4, 8, 32)) -- padding defaults to (1, 1).
    B, cin, H, W = 4, 2, 16, 32
    cout, (kh, kw), (sh, sw) = 4, (3, 3), (2, 1)
    ph, pw = (kh - 1) // 2, (kw - 1) // 2
    ho = (H + 2 * ph - kh) // sh + 1      # 8
    wo = (W + 2 * pw - kw) // sw + 1      # 32

    key = jax.random.PRNGKey(0)
    ks = jax.random.split(key, 10)
    inv_sqrt2 = 1.0 / math.sqrt(2.0)
    params = {
        "w_re": 0.1 * jax.random.normal(ks[0], (cout, cin, kh, kw), jnp.float32),
        "w_im": 0.1 * jax.random.normal(ks[1], (cout, cin, kh, kw), jnp.float32),
        "b_re": 0.1 * jax.random.normal(ks[2], (cout,), jnp.float32),
        "b_im": 0.1 * jax.random.normal(ks[3], (cout,), jnp.float32),
        "gamma_rr": inv_sqrt2 + 0.01 * jax.random.normal(ks[4], (cout, ho, wo), jnp.float32),
        "gamma_ii": inv_sqrt2 + 0.01 * jax.random.normal(ks[5], (cout, ho, wo), jnp.float32),
        "gamma_ri": 0.01 * jax.random.normal(ks[6], (cout, ho, wo), jnp.float32),
        "beta_r": 0.01 * jax.random.normal(ks[7], (cout, ho, wo), jnp.float32),
        "beta_i": 0.01 * jax.random.normal(ks[8], (cout, ho, wo), jnp.float32),
        "prelu_a": jnp.array([0.25], jnp.float32),
    }
    x = jax.random.normal(ks[9], (B, cin, H, W, 2), jnp.float32)

    # Small tiles so the toy shapes exercise grid > 1; for production DCCRN
    # shapes raise conv_tile / bn_tile (512-2048) subject to the VMEM limit.
    fwd = jax.jit(partial(encoder_forward, kernel_size=(kh, kw), stride=(sh, sw),
                          padding=(ph, pw), train=True,
                          conv_tile=256, bn_tile=128))
    out = jax.block_until_ready(fwd(x, params))

    ref = encoder_reference(x, params, (kh, kw), (sh, sw), (ph, pw))
    assert out.shape == (B, cout, ho, wo, 2), out.shape
    assert bool(jnp.all(jnp.isfinite(out)))
    max_err = float(jnp.max(jnp.abs(out - ref)))
    assert max_err < 1e-1, max_err

    print("KERNEL_OK")
</pallas_src>

<mosaic_0001>
module attributes {stable_mosaic.version = 11 : i64} {
  func.func @_cconv_matmul_kernel(%arg0: i32, %arg1: memref<48x256xbf16, #tpu.memory_space<vmem>>, %arg2: memref<16x48xbf16, #tpu.memory_space<vmem>>, %arg3: memref<16x1xf32, #tpu.memory_space<vmem>>, %arg4: memref<16x256xf32, #tpu.memory_space<vmem>>) attributes {dimension_semantics = [#tpu.dimension_semantics<parallel>], iteration_bounds = array<i64: 4>, scalar_prefetch = 0 : i64, scratch_operands = 0 : i64, tpu.core_type = #tpu.core_type<tc>, window_params = [{transform_indices = @transform_0, window_bounds = array<i64: 48, 256>}, {pipeline_mode = #tpu.pipeline_mode<synchronous>, transform_indices = @transform_1, window_bounds = array<i64: 16, 48>}, {pipeline_mode = #tpu.pipeline_mode<synchronous>, transform_indices = @transform_2, window_bounds = array<i64: 16, 1>}, {transform_indices = @transform_3, window_bounds = array<i64: 16, 256>}]} {
    %c0 = arith.constant 0 : index
    %c0_0 = arith.constant 0 : index
    %0 = vector.load %arg2[%c0, %c0_0] : memref<16x48xbf16, #tpu.memory_space<vmem>>, vector<16x48xbf16>
    %c0_1 = arith.constant 0 : index
    %c0_2 = arith.constant 0 : index
    %1 = vector.load %arg1[%c0_1, %c0_2] : memref<48x256xbf16, #tpu.memory_space<vmem>>, vector<48x256xbf16>
    %cst = arith.constant dense<0.000000e+00> : vector<16x256xf32>
    %2 = tpu.matmul %0, %1, %cst {dimension_numbers = #tpu.dot_dimension_numbers<[1], [0], [0], [1], [0, 0, 1, 1], [], []>} : vector<16x48xbf16>, vector<48x256xbf16>, vector<16x256xf32> -> vector<16x256xf32>
    %c0_3 = arith.constant 0 : index
    %c0_4 = arith.constant 0 : index
    %3 = vector.load %arg3[%c0_3, %c0_4] : memref<16x1xf32, #tpu.memory_space<vmem>>, vector<16x1xf32>
    %4 = vector.broadcast %3 : vector<16x1xf32> to vector<16x256xf32>
    %5 = arith.addf %2, %4 : vector<16x256xf32>
    %c0_5 = arith.constant 0 : index
    %c0_6 = arith.constant 0 : index
    %6 = vector.load %arg4[%c0_5, %c0_6] : memref<16x256xf32, #tpu.memory_space<vmem>>, vector<16x256xf32>
    tpu.vector_store %arg4[%c0_5, %c0_6], %5 {strides = array<i32>} : memref<16x256xf32, #tpu.memory_space<vmem>>, vector<16x256xf32>,
    return
  }
  func.func @transform_0(%arg0: i32) -> (i32, i32) {
    %c0_i32 = arith.constant 0 : i32
    %c0_i32_0 = arith.constant 0 : i32
    return %c0_i32, %arg0 : i32, i32
  }
  func.func @transform_1(%arg0: i32) -> (i32, i32) {
    %c0_i32 = arith.constant 0 : i32
    %c0_i32_0 = arith.constant 0 : i32
    %c0_i32_1 = arith.constant 0 : i32
    return %c0_i32, %c0_i32_0 : i32, i32
  }
  func.func @transform_2(%arg0: i32) -> (i32, i32) {
    %c0_i32 = arith.constant 0 : i32
    %c0_i32_0 = arith.constant 0 : i32
    %c0_i32_1 = arith.constant 0 : i32
    return %c0_i32, %c0_i32_0 : i32, i32
  }
  func.func @transform_3(%arg0: i32) -> (i32, i32) {
    %c0_i32 = arith.constant 0 : i32
    %c0_i32_0 = arith.constant 0 : i32
    return %c0_i32, %arg0 : i32, i32
  }
}

module attributes {stable_mosaic.version = 11 : i64} {
  func.func @_cbn_prelu_kernel(%arg0: i32, %arg1: memref<16x4x128xf32, #tpu.memory_space<vmem>>, %arg2: memref<8x1x128xf32, #tpu.memory_space<vmem>>, %arg3: memref<8x1x128xf32, #tpu.memory_space<vmem>>, %arg4: memref<8x1x128xf32, #tpu.memory_space<vmem>>, %arg5: memref<8x1x128xf32, #tpu.memory_space<vmem>>, %arg6: memref<8x1x128xf32, #tpu.memory_space<vmem>>, %arg7: memref<1xf32, #tpu.memory_space<smem>>, %arg8: memref<16x4x128xf32, #tpu.memory_space<vmem>>) attributes {dimension_semantics = [#tpu.dimension_semantics<parallel>], iteration_bounds = array<i64: 2>, scalar_prefetch = 0 : i64, scratch_operands = 0 : i64, tpu.core_type = #tpu.core_type<tc>, window_params = [{transform_indices = @transform_0, window_bounds = array<i64: 16, 4, 128>}, {transform_indices = @transform_1, window_bounds = array<i64: 8, 1, 128>}, {transform_indices = @transform_2, window_bounds = array<i64: 8, 1, 128>}, {transform_indices = @transform_3, window_bounds = array<i64: 8, 1, 128>}, {transform_indices = @transform_4, window_bounds = array<i64: 8, 1, 128>}, {transform_indices = @transform_5, window_bounds = array<i64: 8, 1, 128>}, {transform_indices = @transform_6, window_bounds = array<i64: 1>}, {transform_indices = @transform_7, window_bounds = array<i64: 16, 4, 128>}]} {
    %c0 = arith.constant 0 : index
    %c0_0 = arith.constant 0 : index
    %c0_1 = arith.constant 0 : index
    %0 = vector.load %arg1[%c0, %c0_0, %c0_1] : memref<16x4x128xf32, #tpu.memory_space<vmem>>, vector<16x4x128xf32>
    %1 = vector.extract_strided_slice %0 {offsets = [0, 0, 0], sizes = [8, 4, 128], strides = [1, 1, 1]} : vector<16x4x128xf32> to vector<8x4x128xf32>
    %2 = vector.extract_strided_slice %0 {offsets = [8, 0, 0], sizes = [8, 4, 128], strides = [1, 1, 1]} : vector<16x4x128xf32> to vector<8x4x128xf32>
    %cst = arith.constant dense<0.000000e+00> : vector<8x128xf32>
    %3 = vector.multi_reduction <add>, %1, %cst [1] : vector<8x4x128xf32> to vector<8x128xf32>
    %4 = vector.shape_cast %3 : vector<8x128xf32> to vector<8x1x128xf32>
    %cst_2 = arith.constant 4.000000e+00 : f32
    %5 = vector.broadcast %cst_2 : f32 to vector<8x1x128xf32>
    %6 = arith.divf %4, %5 : vector<8x1x128xf32>
    %cst_3 = arith.constant dense<0.000000e+00> : vector<8x128xf32>
    %7 = vector.multi_reduction <add>, %2, %cst_3 [1] : vector<8x4x128xf32> to vector<8x128xf32>
    %8 = vector.shape_cast %7 : vector<8x128xf32> to vector<8x1x128xf32>
    %cst_4 = arith.constant 4.000000e+00 : f32
    %9 = vector.broadcast %cst_4 : f32 to vector<8x1x128xf32>
    %10 = arith.divf %8, %9 : vector<8x1x128xf32>
    %11 = vector.broadcast %6 : vector<8x1x128xf32> to vector<8x4x128xf32>
    %12 = arith.subf %1, %11 : vector<8x4x128xf32>
    %13 = vector.broadcast %10 : vector<8x1x128xf32> to vector<8x4x128xf32>
    %14 = arith.subf %2, %13 : vector<8x4x128xf32>
    %15 = arith.mulf %12, %12 : vector<8x4x128xf32>
    %cst_5 = arith.constant dense<0.000000e+00> : vector<8x128xf32>
    %16 = vector.multi_reduction <add>, %15, %cst_5 [1] : vector<8x4x128xf32> to vector<8x128xf32>
    %17 = vector.shape_cast %16 : vector<8x128xf32> to vector<8x1x128xf32>
    %cst_6 = arith.constant 4.000000e+00 : f32
    %18 = vector.broadcast %cst_6 : f32 to vector<8x1x128xf32>
    %19 = arith.divf %17, %18 : vector<8x1x128xf32>
    %cst_7 = arith.constant 9.99999974E-6 : f32
    %20 = vector.broadcast %cst_7 : f32 to vector<8x1x128xf32>
    %21 = arith.addf %19, %20 : vector<8x1x128xf32>
    %22 = arith.mulf %14, %14 : vector<8x4x128xf32>
    %cst_8 = arith.constant dense<0.000000e+00> : vector<8x128xf32>
    %23 = vector.multi_reduction <add>, %22, %cst_8 [1] : vector<8x4x128xf32> to vector<8x128xf32>
    %24 = vector.shape_cast %23 : vector<8x128xf32> to vector<8x1x128xf32>
    %cst_9 = arith.constant 4.000000e+00 : f32
    %25 = vector.broadcast %cst_9 : f32 to vector<8x1x128xf32>
    %26 = arith.divf %24, %25 : vector<8x1x128xf32>
    %cst_10 = arith.constant 9.99999974E-6 : f32
    %27 = vector.broadcast %cst_10 : f32 to vector<8x1x128xf32>
    %28 = arith.addf %26, %27 : vector<8x1x128xf32>
    %29 = arith.mulf %12, %14 : vector<8x4x128xf32>
    %cst_11 = arith.constant dense<0.000000e+00> : vector<8x128xf32>
    %30 = vector.multi_reduction <add>, %29, %cst_11 [1] : vector<8x4x128xf32> to vector<8x128xf32>
    %31 = vector.shape_cast %30 : vector<8x128xf32> to vector<8x1x128xf32>
    %cst_12 = arith.constant 4.000000e+00 : f32
    %32 = vector.broadcast %cst_12 : f32 to vector<8x1x128xf32>
    %33 = arith.divf %31, %32 : vector<8x1x128xf32>
    %34 = arith.addf %21, %28 : vector<8x1x128xf32>
    %35 = arith.mulf %21, %28 : vector<8x1x128xf32>
    %36 = arith.mulf %33, %33 : vector<8x1x128xf32>
    %37 = arith.subf %35, %36 : vector<8x1x128xf32>
    %cst_13 = arith.constant 9.99999996E-13 : f32
    %38 = vector.broadcast %cst_13 : f32 to vector<8x1x128xf32>
    %39 = arith.maximumf %37, %38 : vector<8x1x128xf32>
    %40 = math.sqrt %39 : vector<8x1x128xf32>
    %cst_14 = arith.constant 2.000000e+00 : f32
    %41 = vector.broadcast %cst_14 : f32 to vector<8x1x128xf32>
    %42 = arith.mulf %41, %40 : vector<8x1x128xf32>
    %43 = arith.addf %34, %42 : vector<8x1x128xf32>
    %44 = math.sqrt %43 : vector<8x1x128xf32>
    %45 = arith.mulf %40, %44 : vector<8x1x128xf32>
    %46 = tpu.reciprocal %45 {approx = true} : vector<8x1x128xf32> -> vector<8x1x128xf32>
    %47 = arith.addf %28, %40 : vector<8x1x128xf32>
    %48 = arith.mulf %47, %46 : vector<8x1x128xf32>
    %49 = arith.addf %21, %40 : vector<8x1x128xf32>
    %50 = arith.mulf %49, %46 : vector<8x1x128xf32>
    %cst_15 = arith.constant 0.000000e+00 : f32
    %51 = vector.broadcast %cst_15 : f32 to vector<8x1x128xf32>
    %52 = arith.subf %51, %33 : vector<8x1x128xf32>
    %53 = arith.mulf %52, %46 : vector<8x1x128xf32>
    %54 = vector.broadcast %48 : vector<8x1x128xf32> to vector<8x4x128xf32>
    %55 = arith.mulf %54, %12 : vector<8x4x128xf32>
    %56 = vector.broadcast %53 : vector<8x1x128xf32> to vector<8x4x128xf32>
    %57 = arith.mulf %56, %14 : vector<8x4x128xf32>
    %58 = arith.addf %55, %57 : vector<8x4x128xf32>
    %59 = vector.broadcast %53 : vector<8x1x128xf32> to vector<8x4x128xf32>
    %60 = arith.mulf %59, %12 : vector<8x4x128xf32>
    %61 = vector.broadcast %50 : vector<8x1x128xf32> to vector<8x4x128xf32>
    %62 = arith.mulf %61, %14 : vector<8x4x128xf32>
    %63 = arith.addf %60, %62 : vector<8x4x128xf32>
    %c0_16 = arith.constant 0 : index
    %c0_17 = arith.constant 0 : index
    %c0_18 = arith.constant 0 : index
    %64 = vector.load %arg2[%c0_16, %c0_17, %c0_18] : memref<8x1x128xf32, #tpu.memory_space<vmem>>, vector<8x1x128xf32>
    %65 = vector.broadcast %64 : vector<8x1x128xf32> to vector<8x4x128xf32>
    %66 = arith.mulf %65, %58 : vector<8x4x128xf32>
    %c0_19 = arith.constant 0 : index
    %c0_20 = arith.constant 0 : index
    %c0_21 = arith.constant 0 : index
    %67 = vector.load %arg3[%c0_19, %c0_20, %c0_21] : memref<8x1x128xf32, #tpu.memory_space<vmem>>, vector<8x1x128xf32>
    %68 = vector.broadcast %67 : vector<8x1x128xf32> to vector<8x4x128xf32>
    %69 = arith.mulf %68, %63 : vector<8x4x128xf32>
    %70 = arith.addf %66, %69 : vector<8x4x128xf32>
    %c0_22 = arith.constant 0 : index
    %c0_23 = arith.constant 0 : index
    %c0_24 = arith.constant 0 : index
    %71 = vector.load %arg5[%c0_22, %c0_23, %c0_24] : memref<8x1x128xf32, #tpu.memory_space<vmem>>, vector<8x1x128xf32>
    %72 = vector.broadcast %71 : vector<8x1x128xf32> to vector<8x4x128xf32>
    %73 = arith.addf %70, %72 : vector<8x4x128xf32>
    %c0_25 = arith.constant 0 : index
    %c0_26 = arith.constant 0 : index
    %c0_27 = arith.constant 0 : index
    %74 = vector.load %arg3[%c0_25, %c0_26, %c0_27] : memref<8x1x128xf32, #tpu.memory_space<vmem>>, vector<8x1x128xf32>
    %75 = vector.broadcast %74 : vector<8x1x128xf32> to vector<8x4x128xf32>
    %76 = arith.mulf %75, %58 : vector<8x4x128xf32>
    %c0_28 = arith.constant 0 : index
    %c0_29 = arith.constant 0 : index
    %c0_30 = arith.constant 0 : index
    %77 = vector.load %arg4[%c0_28, %c0_29, %c0_30] : memref<8x1x128xf32, #tpu.memory_space<vmem>>, vector<8x1x128xf32>
    %78 = vector.broadcast %77 : vector<8x1x128xf32> to vector<8x4x128xf32>
    %79 = arith.mulf %78, %63 : vector<8x4x128xf32>
    %80 = arith.addf %76, %79 : vector<8x4x128xf32>
    %c0_31 = arith.constant 0 : index
    %c0_32 = arith.constant 0 : index
    %c0_33 = arith.constant 0 : index
    %81 = vector.load %arg6[%c0_31, %c0_32, %c0_33] : memref<8x1x128xf32, #tpu.memory_space<vmem>>, vector<8x1x128xf32>
    %82 = vector.broadcast %81 : vector<8x1x128xf32> to vector<8x4x128xf32>
    %83 = arith.addf %80, %82 : vector<8x4x128xf32>
    %c0_34 = arith.constant 0 : index
    %84 = memref.load %arg7[%c0_34] : memref<1xf32, #tpu.memory_space<smem>>
    %cst_35 = arith.constant 0.000000e+00 : f32
    %85 = vector.broadcast %cst_35 : f32 to vector<8x4x128xf32>
    %86 = arith.cmpf oge, %73, %85 : vector<8x4x128xf32>
    %87 = vector.broadcast %84 : f32 to vector<8x4x128xf32>
    %88 = arith.mulf %87, %73 : vector<8x4x128xf32>
    %89 = arith.select %86, %73, %88 : vector<8x4x128xi1>, vector<8x4x128xf32>
    %cst_36 = arith.constant 0.000000e+00 : f32
    %90 = vector.broadcast %cst_36 : f32 to vector<8x4x128xf32>
    %91 = arith.cmpf oge, %83, %90 : vector<8x4x128xf32>
    %92 = vector.broadcast %84 : f32 to vector<8x4x128xf32>
    %93 = arith.mulf %92, %83 : vector<8x4x128xf32>
    %94 = arith.select %91, %83, %93 : vector<8x4x128xi1>, vector<8x4x128xf32>
    %95 = tpu.concatenate %89, %94 in 0 : vector<8x4x128xf32>, vector<8x4x128xf32> -> vector<16x4x128xf32>
    %c0_37 = arith.constant 0 : index
    %c0_38 = arith.constant 0 : index
    %c0_39 = arith.constant 0 : index
    %96 = vector.load %arg8[%c0_37, %c0_38, %c0_39] : memref<16x4x128xf32, #tpu.memory_space<vmem>>, vector<16x4x128xf32>
    tpu.vector_store %arg8[%c0_37, %c0_38, %c0_39], %95 {strides = array<i32>} : memref<16x4x128xf32, #tpu.memory_space<vmem>>, vector<16x4x128xf32>,
    return
  }
  func.func @transform_0(%arg0: i32) -> (i32, i32, i32) {
    %c0_i32 = arith.constant 0 : i32
    %c0_i32_0 = arith.constant 0 : i32
    %c0_i32_1 = arith.constant 0 : i32
    return %c0_i32, %c0_i32_0, %arg0 : i32, i32, i32
  }
  func.func @transform_1(%arg0: i32) -> (i32, i32, i32) {
    %c0_i32 = arith.constant 0 : i32
    %c0_i32_0 = arith.constant 0 : i32
    %c0_i32_1 = arith.constant 0 : i32
    return %c0_i32, %c0_i32_0, %arg0 : i32, i32, i32
  }
  func.func @transform_2(%arg0: i32) -> (i32, i32, i32) {
    %c0_i32 = arith.constant 0 : i32
    %c0_i32_0 = arith.constant 0 : i32
    %c0_i32_1 = arith.constant 0 : i32
    return %c0_i32, %c0_i32_0, %arg0 : i32, i32, i32
  }
  func.func @transform_3(%arg0: i32) -> (i32, i32, i32) {
    %c0_i32 = arith.constant 0 : i32
    %c0_i32_0 = arith.constant 0 : i32
    %c0_i32_1 = arith.constant 0 : i32
    return %c0_i32, %c0_i32_0, %arg0 : i32, i32, i32
  }
  func.func @transform_4(%arg0: i32) -> (i32, i32, i32) {
    %c0_i32 = arith.constant 0 : i32
    %c0_i32_0 = arith.constant 0 : i32
    %c0_i32_1 = arith.constant 0 : i32
    return %c0_i32, %c0_i32_0, %arg0 : i32, i32, i32
  }
  func.func @transform_5(%arg0: i32) -> (i32, i32, i32) {
    %c0_i32 = arith.constant 0 : i32
    %c0_i32_0 = arith.constant 0 : i32
    %c0_i32_1 = arith.constant 0 : i32
    return %c0_i32, %c0_i32_0, %arg0 : i32, i32, i32
  }
  func.func @transform_6(%arg0: i32) -> i32 {
    %c0_i32 = arith.constant 0 : i32
    %c0_i32_0 = arith.constant 0 : i32
    return %c0_i32 : i32
  }
  func.func @transform_7(%arg0: i32) -> (i32, i32, i32) {
    %c0_i32 = arith.constant 0 : i32
    %c0_i32_0 = arith.constant 0 : i32
    %c0_i32_1 = arith.constant 0 : i32
    return %c0_i32, %c0_i32_0, %arg0 : i32, i32, i32
  }
}

</mosaic_0001>

<bundles_post_ra>
// kernel: encoder_forward.2
= control target key start
LH: loop header
LB: loop body
LE: loop exit
PB: predicated region body
PF: predicated region fallthrough
CT: control target
= control target key end

     0   :  { %s524_s12 = smov 0   ;;  %s526_s13 = smov 0   ;;  %s593_s0 = inlined_call_operand.vmem [shape: bf16[48,1024], index: 0, kind: input, shape index: {}]   ;;  %s594_s1 = inlined_call_operand.vmem [shape: bf16[16,48], index: 1, kind: input, shape index: {}]   ;;  %s595_s2 = inlined_call_operand.vmem [shape: f32[16,1], index: 2, kind: input, shape index: {}]   ;;  %s596_s3 = inlined_call_operand.vmem [shape: f32[16,1024], index: 3, kind: output, shape index: {}]  }
   0x1   :  { %s528_s14 = smov 0  }
   0x2 LB: > { %s418_s15 = sadd.s32 4294967295, %s501_s14   ;;  %s541_s16 = sadd.s32 1, %s501_s14   ;;  %s501_s14 = sphi %s528_s14, %s600_s14   ;;  %s497_s13 = sphi %s526_s13, %s599_s13   ;;  %s493_s12 = sphi %s524_s12, %s598_s12  }
   0x3   : > { %s17_s17 = ssub.s32 %s501_s14, %s541_s16  ;;  %s20_s18 = sadd.s32 1, %s497_s13 }
   0x4   : > { %p18_p0 = scmp.eq.s32.totalorder %s17_s17, 0  ;;  %p27_p1 = scmp.ne.s32.totalorder %s497_s13, %s493_s12 }
   0x5   : > { %p28_p2 = scmp.eq.s32.totalorder %s501_s14, 0  ;;  %p99_p3 = scmp.eq.s32.totalorder %s418_s15, 3 }
   0x6   : > { %s552_s19 = scalar_select %p18_p0, %s497_s13, %s20_s18  }
   0x7   : > { %p29_p4 = por %p28_p2, %p27_p1  ;;  %p554_p5 = por %p99_p3, %p27_p1 }
   0x8   : > { %p421_p6 = scmp.ge.s32.totalorder %s501_s14, 4 }
   0xa   : > { %127 = sbr.rel (%p421_p6) target bundleno = 27 (0x1b), region = 24 }
  0x11   : > { %130 = sbr.rel (!%p29_p4) target bundleno = 27 (0x1b), region = 28  ;;  %s132_s21 = sand.u32 (%p29_p4), 1, %s497_s13  }
  0x12   : > { %s439_s22 = sshll.u32 (%p29_p4), %s501_s14, 3  ;;  %s441_s23 = smul.u32 (%p29_p4), 48, %s132_s21 }
  0x13   : > { %s137_s26 = scalar_lea.vmem (%p29_p4), %s593_s0, %s439_s22 }
  0x14   : > { %v175_v0 = vld [vmem:[%s137_s26] sm:$0xff] (%p29_p4)  ;;  %s134_s27 = scalar_lea.vmem (%p29_p4), [#allocation2], %s441_s23 }
  0x15   : > { %v177_v1 = vld [vmem:[%s137_s26 + $0x20] sm:$0xff] (%p29_p4)  ;;  %176 = vst [vmem:[%s134_s27] sm:$0xff] (%p29_p4), %v175_v0 }
  0x16   : > { %v179_v2 = vld [vmem:[%s137_s26 + $0x40] sm:$0xff] (%p29_p4)  ;;  %178 = vst [vmem:[%s134_s27 + $0x8] sm:$0xff] (%p29_p4), %v177_v1 }
  0x17   : > { %v181_v3 = vld [vmem:[%s137_s26 + $0x60] sm:$0xff] (%p29_p4)  ;;  %180 = vst [vmem:[%s134_s27 + $0x10] sm:$0xff] (%p29_p4), %v179_v2 }
  0x18   : > { %v183_v4 = vld [vmem:[%s137_s26 + $0x80] sm:$0xff]  ;;  %182 = vst [vmem:[%s134_s27 + $0x18] sm:$0xff] %v181_v3 }
  0x19   : > { %v185_v5 = vld [vmem:[%s137_s26 + $0xa0] sm:$0xff]  ;;  %184 = vst [vmem:[%s134_s27 + $0x20] sm:$0xff] %v183_v4 }
  0x1a   : > { %186 = vst [vmem:[%s134_s27 + $0x28] sm:$0xff] %v185_v5 }
  0x1b PF: > { %p424_p7 = scmp.ge.s32.totalorder %s501_s14, 1  ;;  %p191_p8 = scmp.lt.s32.totalorder %s501_s14, 5 }
  0x1d   : > { %p192_p9 = pnand %p424_p7, %p191_p8 }
  0x1e   : > { %s198_s28 = sand.u32 (!%p192_p9), 1, %s493_s12   ;;  %v503_v6 = vmov (!%p192_p9), 0   ;;  %v231_v7 = vld [vmem:[%s595_s2] sm:$0xff] (!%p192_p9)  ;;  %v232_v8 = vld [vmem:[%s595_s2 + $0x8] sm:$0xff] (!%p192_p9)  ;;  %vm278_vm0 = vcmask (!%p192_p9), 392192  }
  0x1f   : > { %195 = sbr.rel (%p192_p9) target bundleno = 274 (0x112), region = 66  ;;  %314 = vmatprep.mubr.bf16.mxu0 (!%p192_p9), %v503_v6  ;;  %468 = vset.pattern.permute.xlu0 (!%p192_p9), %v503_v6  ;;  %v478_v15 = vld [vmem:[%s594_s1] sm:$0xff] (!%p192_p9)   ;;  %s425_s10 = sshll.u32 (!%p192_p9), %s198_s28, 5 }
  0x20   : > { %s442_s29 = smul.u32 (!%p192_p9), 48, %s198_s28  ;;  %235 = vperm.xlu0 (!%p192_p9), %468, %v231_v7   ;;  %s219_s11 = scalar_lea.vmem (!%p192_p9), [#allocation3], %s425_s10 }
  0x22   : > { %s200_s7 = scalar_lea.vmem (!%p192_p9), [#allocation2], %s442_s29 }
  0x23   : > { %v469_v9 = vld [vmem:[%s200_s7 + $0x4] ss:$8 sps:$4 sm:$0xff] (!%p192_p9)   ;;  %v471_v10 = vld [vmem:[%s200_s7] ss:$8 sps:$4 sm:$0xff] (!%p192_p9)   ;;  %v472_v11 = vld [vmem:[%s200_s7 + $0x14] ss:$8 sps:$4 sm:$0xff] (!%p192_p9)  }
  0x24   : > { %282 = vmatprep.subr.bf16.mxu0 (!%p192_p9), %v469_v9  ;;  %240 = vperm.xlu0 (!%p192_p9), %468, %v232_v8   ;;  %v474_v12 = vld [vmem:[%s200_s7 + $0x10] ss:$8 sps:$4 sm:$0xff] (!%p192_p9)   ;;  %v475_v13 = vld [vmem:[%s200_s7 + $0x24] ss:$8 sps:$4 sm:$0xff] (!%p192_p9)   ;;  %v477_v14 = vld [vmem:[%s200_s7 + $0x20] ss:$8 sps:$4 sm:$0xff] (!%p192_p9)  }
  0x25   : > { %283 = vmatpush1.bf16.msra.mxu0 (!%p192_p9), %v471_v10 }
  0x26   : > { %284 = vmatprep.subr.bf16.mxu0 %v472_v11  ;;  %s440_s12 = sshll.u32 (%p554_p5), %s418_s15, 4 }
  0x27   : > { %s338_s21 = scalar_lea.vmem (%p554_p5), %s596_s3, %s440_s12 }
  0x29   : > { %285 = vmatpush1.bf16.msra.mxu0 %v474_v12 }
  0x2a   : > { %286 = vmatprep.subr.bf16.mxu0 %v475_v13 }
  0x2d   : > { %287 = vmatpush1.bf16.msra.mxu0 %v477_v14 }
  0x30   : > { %433 = vmatmul.mubr.msk.bf16.vlgmr.msra.gmra.mrb[0].mxu0 %vm278_vm0, %v478_v15 }
  0x9f   : > { %v236_v16 = vpop.permute.xlu0 %235 }
  0xa3   : > { %v241_v20 = vpop.permute.xlu0 %240 }
 0x103   : > { %v316_v17 = vpop.f32.mrb[0].mxu0  ;;  %335 = sbr.rel (!%p554_p5) target bundleno = 274 (0x112), region = 74 }
 0x104   : > { %v317_v18 = vadd.f32 %v316_v17, %v236_v16  ;;  %v318_v19 = vpop.f32.mrb[1].mxu0 }
 0x105   : > { %v319_v21 = vadd.f32 %v318_v19, %v236_v16  ;;  %v320_v22 = vpop.f32.mrb[2].mxu0 }
 0x106   : > { %325 = vst [vmem:[%s219_s11] sm:$0xff] %v317_v18  ;;  %v321_v23 = vadd.f32 %v320_v22, %v241_v20  ;;  %v322_v24 = vpop.f32.mrb[3].mxu0 }
 0x107   : > { %326 = vst [vmem:[%s219_s11 + $0x8] sm:$0xff] %v319_v21  ;;  %v323_v25 = vadd.f32 %v322_v24, %v241_v20 }
 0x108   : > { %327 = vst [vmem:[%s219_s11 + $0x10] sm:$0xff] %v321_v23 }
 0x109   : > { %328 = vst [vmem:[%s219_s11 + $0x18] sm:$0xff] %v323_v25 }
 0x10d   : > { %v351_v26 = vld [vmem:[%s219_s11] sm:$0xff] }
 0x10e   : > { %v353_v27 = vld [vmem:[%s219_s11 + $0x8] sm:$0xff]  ;;  %352 = vst [vmem:[%s338_s21] sm:$0xff] %v351_v26 }
 0x10f   : > { %v355_v28 = vld [vmem:[%s219_s11 + $0x10] sm:$0xff]  ;;  %354 = vst [vmem:[%s338_s21 + $0x8] sm:$0xff] %v353_v27 }
 0x110   : > { %v357_v29 = vld [vmem:[%s219_s11 + $0x18] sm:$0xff]  ;;  %356 = vst [vmem:[%s338_s21 + $0x40] sm:$0xff] %v355_v28 }
 0x111   : > { %358 = vst [vmem:[%s338_s21 + $0x48] sm:$0xff] %v357_v29 }
 0x112 PF: > { %p10_p10 = scmp.ge.s32.totalorder %s541_s16, 6   ;;  %s598_s12 = smov %s497_s13 }
 0x113   : > { %s599_s13 = smov %s552_s19  ;;  %s600_s14 = smov %s541_s16 }
 0x114   :  { %12 = sbr.rel (!%p10_p10) target bundleno = 2 (0x2), region = 128 }

// kernel: encoder_forward.3
= control target key start
LH: loop header
LB: loop body
LE: loop exit
PB: predicated region body
PF: predicated region fallthrough
CT: control target
= control target key end

     0   :  { %s3219_s0 = inlined_call_operand.vmem [shape: f32[16,4,256], index: 0, kind: input, shape index: {}]   ;;  %s3220_s1 = inlined_call_operand.vmem [shape: f32[8,1,256], index: 1, kind: input, shape index: {}]   ;;  %s3221_s2 = inlined_call_operand.vmem [shape: f32[8,1,256], index: 2, kind: input, shape index: {}]   ;;  %s3222_s3 = inlined_call_operand.vmem [shape: f32[8,1,256], index: 3, kind: input, shape index: {}]   ;;  %s3223_s4 = inlined_call_operand.vmem [shape: f32[8,1,256], index: 4, kind: input, shape index: {}]   ;;  %s3224_s5 = inlined_call_operand.vmem [shape: f32[8,1,256], index: 5, kind: input, shape index: {}]   ;;  %s3225_s6 = inlined_call_operand.<no memory space> [shape: f32[1], index: 6, kind: input, shape index: {}]   ;;  %s3226_s7 = inlined_call_operand.vmem [shape: f32[16,4,256], index: 7, kind: output, shape index: {}]  }
   0x1   :  { %12 = sst [smem:[#allocation2]] %s3225_s6 }
   0x2   :  { %s2350_s26 = smov 0   ;;  %s2352_s27 = smov 0  }
   0x3   :  { %s2354_s28 = smov 0  }
   0x4 LB: > { %s2148_s6 = sadd.s32 4294967295, %s2305_s28   ;;  %s2367_s29 = sadd.s32 1, %s2305_s28   ;;  %s2305_s28 = sphi %s2354_s28, %s3231_s28   ;;  %s2301_s27 = sphi %s2352_s27, %s3230_s27   ;;  %s2297_s26 = sphi %s2350_s26, %s3229_s26  }
   0x5   : > { %s22_s30 = ssub.s32 %s2305_s28, %s2367_s29  ;;  %s25_s8 = sadd.s32 1, %s2301_s27 }
   0x6   : > { %p23_p0 = scmp.eq.s32.totalorder %s22_s30, 0  ;;  %p32_p1 = scmp.ne.s32.totalorder %s2301_s27, %s2297_s26 }
   0x7   : > { %p33_p2 = scmp.eq.s32.totalorder %s2305_s28, 0  ;;  %p213_p3 = scmp.eq.s32.totalorder %s2148_s6, 1 }
   0x8   : > { %s2378_s9 = scalar_select %p23_p0, %s2301_s27, %s25_s8  }
   0x9   : > { %p2380_p4 = por %p33_p2, %p32_p1  ;;  %p2384_p5 = por %p213_p3, %p32_p1 }
   0xa   : > { %p2151_p6 = scmp.ge.s32.totalorder %s2305_s28, 2 }
   0xc   : > { %238 = sbr.rel (%p2151_p6) target bundleno = 73 (0x49), region = 20 }
  0x13   : > { %241 = sbr.rel (!%p2380_p4) target bundleno = 33 (0x21), region = 24  ;;  %s243_s12 = sand.u32 (%p2380_p4), 1, %s2301_s27  }
  0x14   : > { %s2153_s13 = sshll.u32 (%p2380_p4), %s2305_s28, 2  ;;  %s2152_s14 = sshll.u32 (%p2380_p4), %s243_s12, 6 }
  0x15   : > { %s2396_s17 = scalar_lea.vmem (%p2380_p4), %s3219_s0, %s2153_s13  ;;  %s245_s18 = scalar_lea.vmem (%p2380_p4), [#allocation3], %s2152_s14 }
  0x16   : > { %v263_v0 = vld [vmem:[%s2396_s17] sm:$0xf] (%p2380_p4)  ;;  %v265_v1 = vld [vmem:[%s2396_s17 + $0x8] sm:$0xf] (%p2380_p4)  ;;  %v267_v2 = vld [vmem:[%s2396_s17 + $0x10] sm:$0xf] (%p2380_p4) }
  0x17   : > { %264 = vst [vmem:[%s245_s18] sm:$0xf] (%p2380_p4), %v263_v0  ;;  %266 = vst [vmem:[%s245_s18 + $0x4] sm:$0xf] (%p2380_p4), %v265_v1  ;;  %v269_v3 = vld [vmem:[%s2396_s17 + $0x18] sm:$0xf] (%p2380_p4) }
  0x18   : > { %v271_v4 = vld [vmem:[%s2396_s17 + $0x20] sm:$0xf] (%p2380_p4)  ;;  %268 = vst [vmem:[%s245_s18 + $0x8] sm:$0xf] (%p2380_p4), %v267_v2  ;;  %270 = vst [vmem:[%s245_s18 + $0xc] sm:$0xf] (%p2380_p4), %v269_v3 }
  0x19   : > { %272 = vst [vmem:[%s245_s18 + $0x10] sm:$0xf] (%p2380_p4), %v271_v4  ;;  %v273_v5 = vld [vmem:[%s2396_s17 + $0x28] sm:$0xf] (%p2380_p4)  ;;  %v275_v6 = vld [vmem:[%s2396_s17 + $0x30] sm:$0xf] (%p2380_p4) }
  0x1a   : > { %v277_v7 = vld [vmem:[%s2396_s17 + $0x38] sm:$0xf]  ;;  %274 = vst [vmem:[%s245_s18 + $0x14] sm:$0xf] %v273_v5  ;;  %276 = vst [vmem:[%s245_s18 + $0x18] sm:$0xf] %v275_v6 }
  0x1b   : > { %278 = vst [vmem:[%s245_s18 + $0x1c] sm:$0xf] %v277_v7  ;;  %v279_v8 = vld [vmem:[%s2396_s17 + $0x40] sm:$0xf]  ;;  %v281_v9 = vld [vmem:[%s2396_s17 + $0x48] sm:$0xf] }
  0x1c   : > { %v283_v10 = vld [vmem:[%s2396_s17 + $0x50] sm:$0xf]  ;;  %280 = vst [vmem:[%s245_s18 + $0x20] sm:$0xf] %v279_v8  ;;  %282 = vst [vmem:[%s245_s18 + $0x24] sm:$0xf] %v281_v9 }
  0x1d   : > { %284 = vst [vmem:[%s245_s18 + $0x28] sm:$0xf] %v283_v10  ;;  %v285_v11 = vld [vmem:[%s2396_s17 + $0x58] sm:$0xf]  ;;  %v287_v12 = vld [vmem:[%s2396_s17 + $0x60] sm:$0xf] }
  0x1e   : > { %v289_v13 = vld [vmem:[%s2396_s17 + $0x68] sm:$0xf]  ;;  %286 = vst [vmem:[%s245_s18 + $0x2c] sm:$0xf] %v285_v11  ;;  %288 = vst [vmem:[%s245_s18 + $0x30] sm:$0xf] %v287_v12 }
  0x1f   : > { %290 = vst [vmem:[%s245_s18 + $0x34] sm:$0xf] %v289_v13  ;;  %v291_v14 = vld [vmem:[%s2396_s17 + $0x70] sm:$0xf]  ;;  %v293_v15 = vld [vmem:[%s2396_s17 + $0x78] sm:$0xf] }
  0x20   : > { %292 = vst [vmem:[%s245_s18 + $0x38] sm:$0xf] %v291_v14  ;;  %294 = vst [vmem:[%s245_s18 + $0x3c] sm:$0xf] %v293_v15 }
  0x21 PF: > { %349 = sbr.rel (!%p2380_p4) target bundleno = 41 (0x29), region = 65  ;;  %s351_s19 = sand.u32 (%p2380_p4), 1, %s2301_s27  }
  0x22   : > { %s354_s22 = scalar_lea.vmem (%p2380_p4), %s3220_s1, %s2305_s28  ;;  %s2154_s23 = sshll.u32 (%p2380_p4), %s351_s19, 3 }
  0x23   : > { %v370_v16 = vld [vmem:[%s354_s22] sm:$0x1] (%p2380_p4)  ;;  %v372_v17 = vld [vmem:[%s354_s22 + $0x2] sm:$0x1] (%p2380_p4)  ;;  %v374_v18 = vld [vmem:[%s354_s22 + $0x4] sm:$0x1] (%p2380_p4) }
  0x24   : > { %v376_v19 = vld [vmem:[%s354_s22 + $0x6] sm:$0x1] (%p2380_p4)  ;;  %s353_s24 = scalar_lea.vmem (%p2380_p4), [#allocation4], %s2154_s23  ;;  %v378_v20 = vld [vmem:[%s354_s22 + $0x8] sm:$0x1] (%p2380_p4) }
  0x25   : > { %371 = vst [vmem:[%s353_s24] sm:$0x1] (%p2380_p4), %v370_v16  ;;  %373 = vst [vmem:[%s353_s24 + $0x1] sm:$0x1] (%p2380_p4), %v372_v17  ;;  %v380_v21 = vld [vmem:[%s354_s22 + $0xa] sm:$0x1] (%p2380_p4) }
  0x26   : > { %375 = vst [vmem:[%s353_s24 + $0x2] sm:$0x1] (%p2380_p4), %v374_v18  ;;  %377 = vst [vmem:[%s353_s24 + $0x3] sm:$0x1] (%p2380_p4), %v376_v19  ;;  %v382_v22 = vld [vmem:[%s354_s22 + $0xc] sm:$0x1] (%p2380_p4) }
  0x27   : > { %379 = vst [vmem:[%s353_s24 + $0x4] sm:$0x1] (%p2380_p4), %v378_v20  ;;  %381 = vst [vmem:[%s353_s24 + $0x5] sm:$0x1] (%p2380_p4), %v380_v21  ;;  %v384_v23 = vld [vmem:[%s354_s22 + $0xe] sm:$0x1] (%p2380_p4) }
  0x28   : > { %383 = vst [vmem:[%s353_s24 + $0x6] sm:$0x1] %v382_v22  ;;  %385 = vst [vmem:[%s353_s24 + $0x7] sm:$0x1] %v384_v23 }
  0x29 PF: > { %424 = sbr.rel (!%p2380_p4) target bundleno = 49 (0x31), region = 106  ;;  %s426_s25 = sand.u32 (%p2380_p4), 1, %s2301_s27  }
  0x2a   : > { %s429_s12 = scalar_lea.vmem (%p2380_p4), %s3221_s2, %s2305_s28  ;;  %s2155_s13 = sshll.u32 (%p2380_p4), %s426_s25, 3 }
  0x2b   : > { %v445_v24 = vld [vmem:[%s429_s12] sm:$0x1] (%p2380_p4)  ;;  %v447_v25 = vld [vmem:[%s429_s12 + $0x2] sm:$0x1] (%p2380_p4)  ;;  %v449_v26 = vld [vmem:[%s429_s12 + $0x4] sm:$0x1] (%p2380_p4) }
  0x2c   : > { %v451_v27 = vld [vmem:[%s429_s12 + $0x6] sm:$0x1] (%p2380_p4)  ;;  %s428_s14 = scalar_lea.vmem (%p2380_p4), [#allocation5], %s2155_s13  ;;  %v453_v28 = vld [vmem:[%s429_s12 + $0x8] sm:$0x1] (%p2380_p4) }
  0x2d   : > { %446 = vst [vmem:[%s428_s14] sm:$0x1] (%p2380_p4), %v445_v24  ;;  %448 = vst [vmem:[%s428_s14 + $0x1] sm:$0x1] (%p2380_p4), %v447_v25  ;;  %v455_v29 = vld [vmem:[%s429_s12 + $0xa] sm:$0x1] (%p2380_p4) }
  0x2e   : > { %450 = vst [vmem:[%s428_s14 + $0x2] sm:$0x1] (%p2380_p4), %v449_v26  ;;  %452 = vst [vmem:[%s428_s14 + $0x3] sm:$0x1] (%p2380_p4), %v451_v27  ;;  %v457_v30 = vld [vmem:[%s429_s12 + $0xc] sm:$0x1] (%p2380_p4) }
  0x2f   : > { %454 = vst [vmem:[%s428_s14 + $0x4] sm:$0x1] (%p2380_p4), %v453_v28  ;;  %456 = vst [vmem:[%s428_s14 + $0x5] sm:$0x1] (%p2380_p4), %v455_v29  ;;  %v459_v31 = vld [vmem:[%s429_s12 + $0xe] sm:$0x1] (%p2380_p4) }
  0x30   : > { %458 = vst [vmem:[%s428_s14 + $0x6] sm:$0x1] %v457_v30  ;;  %460 = vst [vmem:[%s428_s14 + $0x7] sm:$0x1] %v459_v31 }
  0x31 PF: > { %499 = sbr.rel (!%p2380_p4) target bundleno = 57 (0x39), region = 147  ;;  %s501_s15 = sand.u32 (%p2380_p4), 1, %s2301_s27  }
  0x32   : > { %s504_s18 = scalar_lea.vmem (%p2380_p4), %s3222_s3, %s2305_s28  ;;  %s2156_s19 = sshll.u32 (%p2380_p4), %s501_s15, 3 }
  0x33   : > { %v520_v32 = vld [vmem:[%s504_s18] sm:$0x1] (%p2380_p4)  ;;  %v522_v33 = vld [vmem:[%s504_s18 + $0x2] sm:$0x1] (%p2380_p4)  ;;  %v524_v34 = vld [vmem:[%s504_s18 + $0x4] sm:$0x1] (%p2380_p4) }
  0x34   : > { %v526_v35 = vld [vmem:[%s504_s18 + $0x6] sm:$0x1] (%p2380_p4)  ;;  %s503_s20 = scalar_lea.vmem (%p2380_p4), [#allocation6], %s2156_s19  ;;  %v528_v36 = vld [vmem:[%s504_s18 + $0x8] sm:$0x1] (%p2380_p4) }
  0x35   : > { %521 = vst [vmem:[%s503_s20] sm:$0x1] (%p2380_p4), %v520_v32  ;;  %523 = vst [vmem:[%s503_s20 + $0x1] sm:$0x1] (%p2380_p4), %v522_v33  ;;  %v530_v37 = vld [vmem:[%s504_s18 + $0xa] sm:$0x1] (%p2380_p4) }
  0x36   : > { %525 = vst [vmem:[%s503_s20 + $0x2] sm:$0x1] (%p2380_p4), %v524_v34  ;;  %527 = vst [vmem:[%s503_s20 + $0x3] sm:$0x1] (%p2380_p4), %v526_v35  ;;  %v532_v38 = vld [vmem:[%s504_s18 + $0xc] sm:$0x1] (%p2380_p4) }
  0x37   : > { %529 = vst [vmem:[%s503_s20 + $0x4] sm:$0x1] (%p2380_p4), %v528_v36  ;;  %531 = vst [vmem:[%s503_s20 + $0x5] sm:$0x1] (%p2380_p4), %v530_v37  ;;  %v534_v39 = vld [vmem:[%s504_s18 + $0xe] sm:$0x1] (%p2380_p4) }
  0x38   : > { %533 = vst [vmem:[%s503_s20 + $0x6] sm:$0x1] %v532_v38  ;;  %535 = vst [vmem:[%s503_s20 + $0x7] sm:$0x1] %v534_v39 }
  0x39 PF: > { %574 = sbr.rel (!%p2380_p4) target bundleno = 65 (0x41), region = 188  ;;  %s576_s21 = sand.u32 (%p2380_p4), 1, %s2301_s27  }
  0x3a   : > { %s579_s24 = scalar_lea.vmem (%p2380_p4), %s3223_s4, %s2305_s28  ;;  %s2157_s25 = sshll.u32 (%p2380_p4), %s576_s21, 3 }
  0x3b   : > { %v595_v40 = vld [vmem:[%s579_s24] sm:$0x1] (%p2380_p4)  ;;  %v597_v41 = vld [vmem:[%s579_s24 + $0x2] sm:$0x1] (%p2380_p4)  ;;  %v599_v42 = vld [vmem:[%s579_s24 + $0x4] sm:$0x1] (%p2380_p4) }
  0x3c   : > { %v601_v43 = vld [vmem:[%s579_s24 + $0x6] sm:$0x1] (%p2380_p4)  ;;  %s578_s30 = scalar_lea.vmem (%p2380_p4), [#allocation7], %s2157_s25  ;;  %v603_v44 = vld [vmem:[%s579_s24 + $0x8] sm:$0x1] (%p2380_p4) }
  0x3d   : > { %596 = vst [vmem:[%s578_s30] sm:$0x1] (%p2380_p4), %v595_v40  ;;  %598 = vst [vmem:[%s578_s30 + $0x1] sm:$0x1] (%p2380_p4), %v597_v41  ;;  %v605_v45 = vld [vmem:[%s579_s24 + $0xa] sm:$0x1] (%p2380_p4) }
  0x3e   : > { %600 = vst [vmem:[%s578_s30 + $0x2] sm:$0x1] (%p2380_p4), %v599_v42  ;;  %602 = vst [vmem:[%s578_s30 + $0x3] sm:$0x1] (%p2380_p4), %v601_v43  ;;  %v607_v46 = vld [vmem:[%s579_s24 + $0xc] sm:$0x1] (%p2380_p4) }
  0x3f   : > { %604 = vst [vmem:[%s578_s30 + $0x4] sm:$0x1] (%p2380_p4), %v603_v44  ;;  %606 = vst [vmem:[%s578_s30 + $0x5] sm:$0x1] (%p2380_p4), %v605_v45  ;;  %v609_v47 = vld [vmem:[%s579_s24 + $0xe] sm:$0x1] (%p2380_p4) }
  0x40   : > { %608 = vst [vmem:[%s578_s30 + $0x6] sm:$0x1] %v607_v46  ;;  %610 = vst [vmem:[%s578_s30 + $0x7] sm:$0x1] %v609_v47 }
  0x41 PF: > { %649 = sbr.rel (!%p2380_p4) target bundleno = 73 (0x49), region = 229  ;;  %s651_s8 = sand.u32 (%p2380_p4), 1, %s2301_s27  }
  0x42   : > { %s654_s14 = scalar_lea.vmem (%p2380_p4), %s3224_s5, %s2305_s28  ;;  %s2158_s15 = sshll.u32 (%p2380_p4), %s651_s8, 3 }
  0x43   : > { %v670_v48 = vld [vmem:[%s654_s14] sm:$0x1] (%p2380_p4)  ;;  %v672_v49 = vld [vmem:[%s654_s14 + $0x2] sm:$0x1] (%p2380_p4)  ;;  %v674_v50 = vld [vmem:[%s654_s14 + $0x4] sm:$0x1] (%p2380_p4) }
  0x44   : > { %v676_v51 = vld [vmem:[%s654_s14 + $0x6] sm:$0x1] (%p2380_p4)  ;;  %s653_s16 = scalar_lea.vmem (%p2380_p4), [#allocation8], %s2158_s15  ;;  %v678_v52 = vld [vmem:[%s654_s14 + $0x8] sm:$0x1] (%p2380_p4) }
  0x45   : > { %671 = vst [vmem:[%s653_s16] sm:$0x1] (%p2380_p4), %v670_v48  ;;  %673 = vst [vmem:[%s653_s16 + $0x1] sm:$0x1] (%p2380_p4), %v672_v49  ;;  %v680_v53 = vld [vmem:[%s654_s14 + $0xa] sm:$0x1] (%p2380_p4) }
  0x46   : > { %675 = vst [vmem:[%s653_s16 + $0x2] sm:$0x1] (%p2380_p4), %v674_v50  ;;  %677 = vst [vmem:[%s653_s16 + $0x3] sm:$0x1] (%p2380_p4), %v676_v51  ;;  %v682_v54 = vld [vmem:[%s654_s14 + $0xc] sm:$0x1] (%p2380_p4) }
  0x47   : > { %679 = vst [vmem:[%s653_s16 + $0x4] sm:$0x1] (%p2380_p4), %v678_v52  ;;  %681 = vst [vmem:[%s653_s16 + $0x5] sm:$0x1] (%p2380_p4), %v680_v53  ;;  %v684_v55 = vld [vmem:[%s654_s14 + $0xe] sm:$0x1] (%p2380_p4) }
  0x48   : > { %683 = vst [vmem:[%s653_s16 + $0x6] sm:$0x1] %v682_v54  ;;  %685 = vst [vmem:[%s653_s16 + $0x7] sm:$0x1] %v684_v55 }
  0x49 PF: > { %p2159_p7 = scmp.ge.s32.totalorder %s2305_s28, 1  ;;  %p723_p8 = scmp.lt.s32.totalorder %s2305_s28, 3 }
  0x4b   : > { %p724_p9 = pnand %p2159_p7, %p723_p8 }
  0x4c   : > { %s730_s10 = sand.u32 (!%p724_p9), 1, %s2297_s26   ;;  %vm831_vm0 = vcmask (!%p724_p9), 1043456   ;;  %s2531_s19 = sld [smem:[#allocation2]] (!%p724_p9) }
  0x4d   : > { %727 = sbr.rel (%p724_p9) target bundleno = 327 (0x147), region = 270  ;;  %s2454_s17 = sshll.u32 (!%p724_p9), %s730_s10, 6 }
  0x4e   : > { %s2457_s18 = scalar_lea.vmem (!%p724_p9), [#allocation3], %s2454_s17  ;;  %s2763_s20 = sshll.u32 (!%p724_p9), %s730_s10, 3 }
  0x4f   : > { %v815_v56 = vld [vmem:[%s2457_s18] sm:$0xf] (!%p724_p9)  ;;  %v816_v62 = vld [vmem:[%s2457_s18 + $0x4] sm:$0xf] (!%p724_p9)  ;;  %v2468_v6 = vld [vmem:[%s2457_s18 + $0x8] sm:$0xf] (!%p724_p9) }
  0x50   : > { %v823_v57 = vld [vmem:[%s2457_s18 + $0x20] sm:$0xf] (!%p724_p9)  ;;  %v832_v58 = vsel (!%p724_p9), %vm831_vm0, %v815_v56, 0.0  ;;  %v824_v63 = vld [vmem:[%s2457_s18 + $0x24] sm:$0xf] (!%p724_p9)  ;;  %v839_v2 = vsel (!%p724_p9), %vm831_vm0, %v816_v62, 0.0 }
  0x51   : > { %v897_v59 = vsel (!%p724_p9), %vm831_vm0, %v823_v57, 0.0  ;;  %v833_v60 = vrot.slane (!%p724_p9), %v832_v58, 4  ;;  %v904_v3 = vsel (!%p724_p9), %vm831_vm0, %v824_v63, 0.0  ;;  %v840_v4 = vrot.slane (!%p724_p9), %v839_v2, 4  ;;  %v2471_v7 = vld [vmem:[%s2457_s18 + $0x28] sm:$0xf] (!%p724_p9) }
  0x52   : > { %v898_v61 = vrot.slane (!%p724_p9), %v897_v59, 4  ;;  %v905_v5 = vrot.slane (!%p724_p9), %v904_v3, 4  ;;  %v846_v10 = vsel (!%p724_p9), %vm831_vm0, %v2468_v6, 0.0  ;;  %v911_v11 = vsel (!%p724_p9), %vm831_vm0, %v2471_v7, 0.0  ;;  %v2478_v18 = vld [vmem:[%s2457_s18 + $0xc] sm:$0xf] (!%p724_p9) }
  0x53   : > { %v834_v0 = vadd.f32 (!%p724_p9), %v833_v60, %v832_v58  ;;  %v841_v12 = vadd.f32 (!%p724_p9), %v840_v4, %v839_v2  ;;  %v847_v14 = vrot.slane (!%p724_p9), %v846_v10, 4  ;;  %v912_v15 = vrot.slane (!%p724_p9), %v911_v11, 4  ;;  %v2481_v19 = vld [vmem:[%s2457_s18 + $0x2c] sm:$0xf] (!%p724_p9)  ;;  %s2789_s26 = scalar_lea.vmem (!%p724_p9), [#allocation4], %s2763_s20  ;;  %s2793_s21 = scalar_lea.vmem (!%p724_p9), [#allocation5], %s2763_s20 }
  0x54   : > { %v899_v1 = vadd.f32 %v898_v61, %v897_v59  ;;  %v906_v13 = vadd.f32 %v905_v5, %v904_v3  ;;  %v853_v26 = vsel %vm831_vm0, %v2478_v18, 0.0  ;;  %v918_v27 = vsel %vm831_vm0, %v2481_v19, 0.0  ;;  %s2819_s22 = scalar_lea.vmem [#allocation7], %s2763_s20  ;;  %s2871_s23 = scalar_lea.vmem [#allocation9], %s2454_s17 }
  0x55   : > { %v835_v8 = vrot.slane %v834_v0, 2  ;;  %v842_v20 = vrot.slane %v841_v12, 2  ;;  %v848_v22 = vadd.f32 %v847_v14, %v846_v10  ;;  %v913_v23 = vadd.f32 %v912_v15, %v911_v11  ;;  %s2984_s24 = scalar_lea.vmem [#allocation6], %s2763_s20  ;;  %s3035_s25 = scalar_lea.vmem [#allocation8], %s2763_s20 }
  0x56   : > { %v900_v9 = vrot.slane %v899_v1, 2  ;;  %v907_v21 = vrot.slane %v906_v13, 2  ;;  %v854_v34 = vrot.slane %v853_v26, 4  ;;  %v919_v42 = vrot.slane %v918_v27, 4  ;;  %s2208_s30 = sshll.u32 (%p2384_p5), %s2148_s6, 2 }
  0x57   : > { %v836_v16 = vadd.f32 %v835_v8, %v834_v0  ;;  %v843_v28 = vadd.f32 %v842_v20, %v841_v12  ;;  %v849_v30 = vrot.slane %v848_v22, 2  ;;  %v914_v31 = vrot.slane %v913_v23, 2  ;;  %s1907_s13 = scalar_lea.vmem (%p2384_p5), %s3226_s7, %s2208_s30 }
  0x58   : > { %v901_v17 = vadd.f32 %v900_v9, %v899_v1  ;;  %v908_v29 = vadd.f32 %v907_v21, %v906_v13  ;;  %v855_v41 = vadd.f32 %v854_v34, %v853_v26  ;;  %v2497_v59 = vadd.f32 %v919_v42, %v918_v27 }
  0x59   : > { %v837_v24 = vrot.slane %v836_v16, 1  ;;  %v844_v35 = vrot.slane %v843_v28, 1  ;;  %v850_v37 = vadd.f32 %v849_v30, %v848_v22  ;;  %v915_v38 = vadd.f32 %v914_v31, %v913_v23 }
  0x5a   : > { %v902_v25 = vrot.slane %v901_v17, 1  ;;  %v909_v36 = vrot.slane %v908_v29, 1  ;;  %v856_v49 = vrot.slane %v855_v41, 2 }
  0x5b   : > { %v838_v32 = vadd.f32 %v837_v24, %v836_v16  ;;  %v845_v43 = vadd.f32 %v844_v35, %v843_v28  ;;  %v851_v45 = vrot.slane %v850_v37, 1  ;;  %v916_v46 = vrot.slane %v915_v38, 1 }
  0x5c   : > { %v903_v33 = vadd.f32 %v902_v25, %v901_v17  ;;  %v910_v44 = vadd.f32 %v909_v36, %v908_v29  ;;  %v2506_v3 = vadd.f32 %v856_v49, %v855_v41 }
  0x5d   : > { %v889_v39 = vmul.f32 0.25, %v838_v32  ;;  %v890_v50 = vmul.f32 0.25, %v845_v43  ;;  %v852_v52 = vadd.f32 %v851_v45, %v850_v37  ;;  %v917_v53 = vadd.f32 %v916_v46, %v915_v38 }
  0x5e   : > { %v953_v40 = vmul.f32 0.25, %v903_v33  ;;  %v954_v51 = vmul.f32 0.25, %v910_v44 }
  0x5f   : > { %v2487_v47 = vsub.f32 %v815_v56, %v889_v39  ;;  %v2499_v56 = vsub.f32 %v816_v62, %v890_v50  ;;  %v891_v60 = vmul.f32 0.25, %v852_v52  ;;  %v955_v61 = vmul.f32 0.25, %v917_v53 }
  0x60   : > { %v2489_v48 = vsub.f32 %v823_v57, %v953_v40  ;;  %v2501_v57 = vsub.f32 %v824_v63, %v954_v51 }
  0x61   : > { %v977_v54 = vmul.f32 %v2487_v47, %v2487_v47  ;;  %v978_v9 = vmul.f32 %v2499_v56, %v2499_v56  ;;  %v2515_v10 = vsub.f32 %v2468_v6, %v891_v60  ;;  %v2518_v11 = vsub.f32 %v2471_v7, %v955_v61 }
  0x62   : > { %v1057_v55 = vmul.f32 %v2489_v48, %v2489_v48  ;;  %v1137_v58 = vmul.f32 %v2489_v48, %v2487_v47  ;;  %v1058_v62 = vmul.f32 %v2501_v57, %v2501_v57  ;;  %v1138_v63 = vmul.f32 %v2501_v57, %v2499_v56 }
  0x63   : > { %v985_v0 = vsel %vm831_vm0, %v977_v54, 0.0  ;;  %v992_v15 = vsel %vm831_vm0, %v978_v9, 0.0  ;;  %v979_v21 = vmul.f32 %v2515_v10, %v2515_v10  ;;  %v1059_v27 = vmul.f32 %v2518_v11, %v2518_v11 }
  0x64   : > { %v1065_v1 = vsel %vm831_vm0, %v1057_v55, 0.0  ;;  %v1145_v2 = vsel %vm831_vm0, %v1137_v58, 0.0  ;;  %v986_v4 = vrot.slane %v985_v0, 4  ;;  %v993_v16 = vrot.slane %v992_v15, 4 }
  0x65   : > { %v1066_v5 = vrot.slane %v1065_v1, 4  ;;  %v1146_v8 = vrot.slane %v1145_v2, 4  ;;  %v1072_v17 = vsel %vm831_vm0, %v1058_v62, 0.0  ;;  %v1152_v20 = vsel %vm831_vm0, %v1138_v63, 0.0 }
  0x66   : > { %v987_v12 = vadd.f32 %v986_v4, %v985_v0  ;;  %v1073_v24 = vrot.slane %v1072_v17, 4  ;;  %v994_v25 = vadd.f32 %v993_v16, %v992_v15  ;;  %v1153_v7 = vrot.slane %v1152_v20, 4 }
  0x67   : > { %v1067_v13 = vadd.f32 %v1066_v5, %v1065_v1  ;;  %v1147_v14 = vadd.f32 %v1146_v8, %v1145_v2  ;;  %v999_v26 = vsel %vm831_vm0, %v979_v21, 0.0  ;;  %v1079_v35 = vsel %vm831_vm0, %v1059_v27, 0.0 }
  0x68   : > { %v988_v22 = vrot.slane %v987_v12, 2  ;;  %v1074_v31 = vadd.f32 %v1073_v24, %v1072_v17  ;;  %v995_v32 = vrot.slane %v994_v25, 2  ;;  %v1154_v33 = vadd.f32 %v1153_v7, %v1152_v20 }
  0x69   : > { %v1068_v23 = vrot.slane %v1067_v13, 2  ;;  %v1148_v6 = vrot.slane %v1147_v14, 2  ;;  %v1000_v34 = vrot.slane %v999_v26, 4  ;;  %v1080_v43 = vrot.slane %v1079_v35, 4 }
  0x6a   : > { %v989_v28 = vadd.f32 %v988_v22, %v987_v12  ;;  %v1075_v39 = vrot.slane %v1074_v31, 2  ;;  %v996_v40 = vadd.f32 %v995_v32, %v994_v25  ;;  %v1155_v41 = vrot.slane %v1154_v33, 2 }
  0x6b   : > { %v1069_v29 = vadd.f32 %v1068_v23, %v1067_v13  ;;  %v1149_v30 = vadd.f32 %v1148_v6, %v1147_v14  ;;  %v1001_v42 = vadd.f32 %v1000_v34, %v999_v26  ;;  %v1081_v53 = vadd.f32 %v1080_v43, %v1079_v35  ;;  %v2561_v34 = vld [vmem:[%s2457_s18 + $0x10] sm:$0xf] }
  0x6c   : > { %v990_v36 = vrot.slane %v989_v28, 1  ;;  %v1076_v49 = vadd.f32 %v1075_v39, %v1074_v31  ;;  %v997_v50 = vrot.slane %v996_v40, 1  ;;  %v1156_v51 = vadd.f32 %v1155_v41, %v1154_v33 }
  0x6d   : > { %v1070_v37 = vrot.slane %v1069_v29, 1  ;;  %v1150_v38 = vrot.slane %v1149_v30, 1  ;;  %v1002_v52 = vrot.slane %v1001_v42, 2  ;;  %v1082_v2 = vrot.slane %v1081_v53, 2 }
  0x6e   : > { %v991_v44 = vadd.f32 %v990_v36, %v989_v28  ;;  %v1077_v60 = vrot.slane %v1076_v49, 1  ;;  %v998_v61 = vadd.f32 %v997_v50, %v996_v40  ;;  %v1157_v0 = vrot.slane %v1156_v51, 1 }
  0x6f   : > { %v1071_v45 = vadd.f32 %v1070_v37, %v1069_v29  ;;  %v1151_v46 = vadd.f32 %v1150_v38, %v1149_v30  ;;  %v1003_v1 = vadd.f32 %v1002_v52, %v1001_v42  ;;  %v858_v9 = vrot.slane %v2506_v3, 1 }
  0x70   : > { %v1041_v54 = vmul.f32 0.25, %v991_v44  ;;  %v1042_v62 = vmul.f32 0.25, %v998_v61  ;;  %v1078_v63 = vadd.f32 %v1077_v60, %v1076_v49  ;;  %v1158_v12 = vadd.f32 %v1157_v0, %v1156_v51  ;;  %v2581_v49 = vld [vmem:[%s2457_s18 + $0x14] sm:$0xf] }
  0x71   : > { %v1121_v55 = vmul.f32 0.25, %v1071_v45  ;;  %v2529_v58 = vmul.f32 0.25, %v1151_v46  ;;  %v1004_v13 = vrot.slane %v1003_v1, 1  ;;  %v1083_v15 = vadd.f32 %v1082_v2, %v1081_v53 }
  0x72   : > { %v2533_v4 = vadd.f32 1e-05, %v1041_v54  ;;  %v1139_v16 = vmul.f32 %v2518_v11, %v2515_v10  ;;  %v2544_v17 = vadd.f32 1e-05, %v1042_v62  ;;  %v1122_v20 = vmul.f32 0.25, %v1078_v63 }
  0x73   : > { %v2535_v5 = vadd.f32 1e-05, %v1121_v55  ;;  %v1225_v8 = vmul.f32 %v2529_v58, %v2529_v58  ;;  %v2546_v21 = vmul.f32 0.25, %v1158_v12  ;;  %v921_v22 = vrot.slane %v2497_v59, 2 }
  0x74   : > { %v1084_v6 = vrot.slane %v1083_v15, 1  ;;  %v1159_v24 = vsel %vm831_vm0, %v1139_v16, 0.0  ;;  %v859_v25 = vadd.f32 %v858_v9, %v2506_v3  ;;  %v2551_v7 = vadd.f32 1e-05, %v1122_v20  ;;  %v2564_v3 = vld [vmem:[%s2457_s18 + $0x30] sm:$0xf] }
  0x75   : > { %v1217_v14 = vmul.f32 %v2535_v5, %v2533_v4  ;;  %v1226_v26 = vmul.f32 %v2546_v21, %v2546_v21  ;;  %v1005_v27 = vadd.f32 %v1004_v13, %v1003_v1  ;;  %v1160_v29 = vrot.slane %v1159_v24, 4 }
  0x76   : > { %v892_v30 = vmul.f32 0.25, %v859_v25  ;;  %v1218_v31 = vmul.f32 %v2551_v7, %v2544_v17  ;;  %v1085_v32 = vadd.f32 %v1084_v6, %v1083_v15  ;;  %v922_v33 = vadd.f32 %v921_v22, %v2497_v59 }
  0x77   : > { %v1233_v23 = vsub.f32 %v1217_v14, %v1225_v8  ;;  %v2568_v35 = vstv %s2531_s19  ;;  %v1043_v37 = vmul.f32 0.25, %v1005_v27  ;;  %v1161_v38 = vadd.f32 %v1160_v29, %v1159_v24 }
  0x78   : > { %v1234_v36 = vsub.f32 %v1218_v31, %v1226_v26  ;;  %v923_v39 = vrot.slane %v922_v33, 1  ;;  %v1425_v40 = vsub.f32 0.0, %v2529_v58  ;;  %v2572_v41 = vsub.f32 %v2478_v18, %v892_v30 }
  0x79   : > { %v2555_v28 = vmax.f32 %v1233_v23, 1e-12  ;;  %v860_v59 = vsel %vm831_vm0, %v2561_v34, 0.0  ;;  %v925_v42 = vsel %vm831_vm0, %v2564_v3, 0.0  ;;  %v1123_v44 = vmul.f32 0.25, %v1085_v32 }
  0x7a   : > { %v2578_v43 = vmax.f32 %v1234_v36, 1e-12  ;;  %v1162_v45 = vrot.slane %v1161_v38, 2  ;;  %v924_v46 = vadd.f32 %v923_v39, %v922_v33  ;;  %v1209_v50 = vadd.f32 %v2535_v5, %v2533_v4  ;;  %v2619_v32 = vld [vmem:[%s2457_s18 + $0x34] sm:$0xf] }
  0x7b   : > { %2235 = vrsqrt.f32 %v2555_v28  ;;  %v980_v18 = vmul.f32 %v2572_v41, %v2572_v41  ;;  %v861_v51 = vrot.slane %v860_v59, 4  ;;  %v926_v52 = vrot.slane %v925_v42, 4 }
  0x7c   : > { %vm1251_vm1 = vcmp.eq.f32.partialorder %v2555_v28, inf  ;;  %v2590_v53 = vadd.f32 %v2551_v7, %v2544_v17  ;;  %2237 = vrsqrt.f32 %v2578_v43  ;;  %v2593_v54 = vadd.f32 1e-05, %v1043_v37 }
  0x7d   : > { %vm1253_vm2 = vcmp.eq.f32.partialorder %v2555_v28, 0.0  ;;  %v1163_v55 = vadd.f32 %v1162_v45, %v1161_v38  ;;  %v956_v60 = vmul.f32 0.25, %v924_v46  ;;  %v867_v61 = vsel %vm831_vm0, %v2581_v49, 0.0 }
  0x7e   : > { %v2598_v0 = vadd.f32 1e-05, %v1123_v44  ;;  %v1006_v1 = vsel %vm831_vm0, %v980_v18, 0.0  ;;  %v862_v2 = vadd.f32 %v861_v51, %v860_v59  ;;  %v927_v8 = vadd.f32 %v926_v52, %v925_v42 }
  0x7f   : > { %v1254_v9 = vand.u32 2147483648, %v2555_v28  ;;  %v1164_v62 = vrot.slane %v1163_v55, 1  ;;  %v2603_v63 = vsub.f32 %v2481_v19, %v956_v60  ;;  %v1007_v12 = vrot.slane %v1006_v1, 4 }
  0x80   : > { %vm1258_vm3 = vcmp.eq.f32.partialorder %v2578_v43, inf  ;;  %v1261_v13 = vand.u32 2147483648, %v2578_v43  ;;  %v863_v14 = vrot.slane %v862_v2, 2  ;;  %v868_v15 = vrot.slane %v867_v61, 4 }
  0x81   : > { %v1165_v20 = vadd.f32 %v1164_v62, %v1163_v55  ;;  %v1008_v22 = vadd.f32 %v1007_v12, %v1006_v1  ;;  %v1060_v23 = vmul.f32 %v2603_v63, %v2603_v63  ;;  %v1140_v6 = vmul.f32 %v2603_v63, %v2572_v41 }
  0x82   : > { %v1219_v24 = vmul.f32 %v2598_v0, %v2593_v54  ;;  %v864_v25 = vadd.f32 %v863_v14, %v862_v2  ;;  %v928_v26 = vrot.slane %v927_v8, 2  ;;  %v869_v38 = vadd.f32 %v868_v15, %v867_v61 }
  0x83   : > { %v2614_v27 = vmul.f32 0.25, %v1165_v20  ;;  %v1009_v29 = vrot.slane %v1008_v22, 2  ;;  %v1086_v30 = vsel %vm831_vm0, %v1060_v23, 0.0  ;;  %v1166_v31 = vsel %vm831_vm0, %v1140_v6, 0.0 }
  0x84   : > { %v1087_v36 = vrot.slane %v1086_v30, 4  ;;  %v1167_v37 = vrot.slane %v1166_v31, 4  ;;  %v865_v44 = vrot.slane %v864_v25, 1  ;;  %v929_v51 = vadd.f32 %v928_v26, %v927_v8 }
  0x85   : > { %v2236_v16 = vpop.eup %2235  ;;  %v1227_v59 = vmul.f32 %v2614_v27, %v2614_v27  ;;  %v1010_v42 = vadd.f32 %v1009_v29, %v1008_v22  ;;  %v932_v52 = vsel %vm831_vm0, %v2619_v32, 0.0  ;;  %vm1260_vm4 = vcmp.eq.f32.partialorder %v2578_v43, 0.0 }
  0x86   : > { %v1250_v19 = vmul.f32 %v2236_v16, %v2555_v28  ;;  %v2238_v45 = vpop.eup %2237  ;;  %v1088_v18 = vadd.f32 %v1087_v36, %v1086_v30  ;;  %v866_v14 = vadd.f32 %v865_v44, %v864_v25  ;;  %v930_v16 = vrot.slane %v929_v51, 1 }
  0x87   : > { %v1257_v55 = vmul.f32 %v2238_v45, %v2578_v43  ;;  %v1235_v60 = vsub.f32 %v1219_v24, %v1227_v59  ;;  %v1011_v61 = vrot.slane %v1010_v42, 1  ;;  %v933_v20 = vrot.slane %v932_v52, 4 }
  0x88   : > { %v1252_v33 = vsel %vm1251_vm1, %v2555_v28, %v1250_v19  ;;  %v1168_v28 = vadd.f32 %v1167_v37, %v1166_v31  ;;  %v1089_v2 = vrot.slane %v1088_v18, 2  ;;  %v2648_v23 = vadd.f32 %v2598_v0, %v2593_v54 }
  0x89   : > { %v2626_v39 = vsel %vm1253_vm2, %v1254_v9, %v1252_v33  ;;  %v870_v9 = vrot.slane %v869_v38, 2  ;;  %v1259_v62 = vsel %vm1258_vm3, %v2578_v43, %v1257_v55  ;;  %v2640_v12 = vmax.f32 %v1235_v60, 1e-12 }
  0x8a   : > { %v1305_v46 = vmul.f32 2.0, %v2626_v39  ;;  %v1169_v8 = vrot.slane %v1168_v28, 2  ;;  %v1012_v15 = vadd.f32 %v1011_v61, %v1010_v42  ;;  %v2643_v22 = vsel %vm1260_vm4, %v1261_v13, %v1259_v62 }
  0x8b   : > { %v2653_v43 = vadd.f32 %v2626_v39, %v2535_v5  ;;  %v1306_v6 = vmul.f32 2.0, %v2643_v22  ;;  %v1427_v19 = vsub.f32 0.0, %v2614_v27  ;;  %v871_v24 = vadd.f32 %v870_v9, %v869_v38 }
  0x8c   : > { %v2634_v1 = vadd.f32 %v1305_v46, %v1209_v50  ;;  %v1426_v50 = vsub.f32 0.0, %v2546_v21  ;;  %v2659_v13 = vadd.f32 %v2626_v39, %v2533_v4  ;;  %v1090_v25 = vadd.f32 %v1089_v2, %v1088_v18 }
  0x8d   : > { %v1170_v26 = vadd.f32 %v1169_v8, %v1168_v28  ;;  %v893_v29 = vmul.f32 0.25, %v866_v14  ;;  %v2662_v30 = vadd.f32 %v1306_v6, %v2590_v53  ;;  %v1044_v31 = vmul.f32 0.25, %v1012_v15 }
  0x8e   : > { %2239 = vrsqrt.f32 %v2634_v1  ;;  %v931_v33 = vadd.f32 %v930_v16, %v929_v51  ;;  %v934_v36 = vadd.f32 %v933_v20, %v932_v52  ;;  %vm1323_vm5 = vcmp.eq.f32.partialorder %v2634_v1, inf }
  0x8f   : > { %2241 = vrsqrt.f32 %v2640_v12  ;;  %v1091_v5 = vrot.slane %v1090_v25, 1  ;;  %v1171_v37 = vrot.slane %v1170_v26, 1  ;;  %v2666_v59 = vsub.f32 %v2561_v34, %v893_v29 }
  0x90   : > { %vm1325_vm6 = vcmp.eq.f32.partialorder %v2634_v1, 0.0  ;;  %v1326_v4 = vand.u32 2147483648, %v2634_v1  ;;  %2243 = vrsqrt.f32 %v2662_v30  ;;  %vm1265_vm7 = vcmp.eq.f32.partialorder %v2640_v12, inf }
  0x91   : > { %v1092_v53 = vadd.f32 %v1091_v5, %v1090_v25  ;;  %v1172_v38 = vadd.f32 %v1171_v37, %v1170_v26  ;;  %v957_v42 = vmul.f32 0.25, %v931_v33  ;;  %v981_v44 = vmul.f32 %v2666_v59, %v2666_v59 }
  0x92   : > { %vm1267_vm8 = vcmp.eq.f32.partialorder %v2640_v12, 0.0  ;;  %v2675_v45 = vadd.f32 1e-05, %v1044_v31  ;;  %v872_v34 = vrot.slane %v871_v24, 1  ;;  %v935_v46 = vrot.slane %v934_v36, 2 }
  0x93   : > { %v1124_v18 = vmul.f32 0.25, %v1092_v53  ;;  %v2677_v51 = vmul.f32 0.25, %v1172_v38  ;;  %v2680_v52 = vsub.f32 %v2564_v3, %v957_v42  ;;  %v1013_v55 = vsel %vm831_vm0, %v981_v44, 0.0  ;;  %v2702_v31 = vld [vmem:[%s2457_s18 + $0x18] sm:$0xf] }
  0x94   : > { %vm1330_vm9 = vcmp.eq.f32.partialorder %v2662_v30, inf  ;;  %v1268_v61 = vand.u32 2147483648, %v2640_v12  ;;  %v1014_v28 = vrot.slane %v1013_v55, 4  ;;  %v936_v2 = vadd.f32 %v935_v46, %v934_v36 }
  0x95   : > { %vm1332_vm10 = vcmp.eq.f32.partialorder %v2662_v30, 0.0  ;;  %v2687_v8 = vadd.f32 1e-05, %v1124_v18  ;;  %v1228_v3 = vmul.f32 %v2677_v51, %v2677_v51  ;;  %v1061_v16 = vmul.f32 %v2680_v52, %v2680_v52 }
  0x96   : > { %v1015_v15 = vadd.f32 %v1014_v28, %v1013_v55  ;;  %v873_v20 = vadd.f32 %v872_v34, %v871_v24  ;;  %v1141_v26 = vmul.f32 %v2680_v52, %v2666_v59  ;;  %v937_v29 = vrot.slane %v936_v2, 1 }
  0x97   : > { %v1220_v25 = vmul.f32 %v2687_v8, %v2675_v45  ;;  %v1093_v5 = vsel %vm831_vm0, %v1061_v16, 0.0  ;;  %v874_v46 = vsel %vm831_vm0, %v2702_v31, 0.0 }
  0x98   : > { %v2240_v60 = vpop.eup %2239  ;;  %v1016_v36 = vrot.slane %v1015_v15, 2  ;;  %v1094_v42 = vrot.slane %v1093_v5, 4  ;;  %v938_v28 = vadd.f32 %v937_v29, %v936_v2  ;;  %v2741_v2 = vadd.f32 %v2643_v22, %v2544_v17 }
  0x99   : > { %v2242_v9 = vpop.eup %2241  ;;  %v1322_v62 = vmul.f32 %v2240_v60, %v2634_v1  ;;  %v1236_v38 = vsub.f32 %v1220_v25, %v1228_v3  ;;  %v1173_v3 = vsel %vm831_vm0, %v1141_v26, 0.0 }
  0x9a   : > { %v1264_v14 = vmul.f32 %v2242_v9, %v2640_v12  ;;  %v2244_v44 = vpop.eup %2243  ;;  %v1017_v34 = vadd.f32 %v1016_v36, %v1015_v15  ;;  %v2726_v9 = vld [vmem:[%s2457_s18 + $0x38] sm:$0xf]  ;;  %v958_v26 = vmul.f32 0.25, %v938_v28 }
  0x9b   : > { %v1324_v6 = vsel %vm1323_vm5, %v2634_v1, %v1322_v62  ;;  %v1333_v1 = vand.u32 2147483648, %v2662_v30  ;;  %v1329_v18 = vmul.f32 %v2244_v44, %v2662_v30 }
  0x9c   : > { %v1327_v33 = vsel %vm1325_vm6, %v1326_v4, %v1324_v6  ;;  %v1266_v24 = vsel %vm1265_vm7, %v2640_v12, %v1264_v14  ;;  %v894_v12 = vmul.f32 0.25, %v873_v20  ;;  %v1018_v60 = vrot.slane %v1017_v34, 1 }
  0x9d   : > { %v1377_v37 = vmul.f32 %v1327_v33, %v2626_v39  ;;  %v2713_v53 = vsel %vm1267_vm8, %v1268_v61, %v1266_v24  ;;  %v2720_v39 = vmax.f32 %v1236_v38, 1e-12  ;;  %v1095_v61 = vadd.f32 %v1094_v42, %v1093_v5 }
  0x9e   : > { %v1307_v4 = vmul.f32 2.0, %v2713_v53  ;;  %v1331_v62 = vsel %vm1330_vm9, %v2662_v30, %v1329_v18  ;;  %v875_v14 = vrot.slane %v874_v46, 4  ;;  %v2747_v20 = vadd.f32 %v2687_v8, %v2675_v45 }
  0x9f   : > { %2245 = vrcp.f32 %v1377_v37  ;;  %v1334_v15 = vsel %vm1332_vm10, %v1333_v1, %v1331_v62  ;;  %v1019_v6 = vadd.f32 %v1018_v60, %v1017_v34  ;;  %v939_v30 = vsel %vm831_vm0, %v2726_v9, 0.0 }
  0xa0   : > { %v2723_v55 = vadd.f32 %v1307_v4, %v2648_v23  ;;  %2247 = vrsqrt.f32 %v2720_v39  ;;  %v2737_v23 = vadd.f32 %v2643_v22, %v2551_v7  ;;  %v1378_v16 = vmul.f32 %v1334_v15, %v2643_v22 }
  0xa1   : > { %v1096_v25 = vrot.slane %v1095_v61, 2  ;;  %v1174_v7 = vrot.slane %v1173_v3, 4  ;;  %v2752_v29 = vsub.f32 %v2581_v49, %v894_v12  ;;  %vm1272_vm11 = vcmp.eq.f32.partialorder %v2720_v39, inf }
  0xa2   : > { %2249 = vrsqrt.f32 %v2723_v55  ;;  %v1045_v17 = vmul.f32 0.25, %v1019_v6  ;;  %v876_v22 = vadd.f32 %v875_v14, %v874_v46  ;;  %vm1274_vm12 = vcmp.eq.f32.partialorder %v2720_v39, 0.0 }
  0xa3   : > { %2251 = vrcp.f32 %v1378_v16  ;;  %v1097_v33 = vadd.f32 %v1096_v25, %v1095_v61  ;;  %v1175_v24 = vadd.f32 %v1174_v7, %v1173_v3  ;;  %v2757_v36 = vsub.f32 %v2619_v32, %v958_v26  ;;  %v2796_v7 = vld [vmem:[%s2793_s21] ss:$0 sm:$0xff] }
  0xa4   : > { %v982_v5 = vmul.f32 %v2752_v29, %v2752_v29  ;;  %vm1337_vm13 = vcmp.eq.f32.partialorder %v2723_v55, inf  ;;  %vm1339_vm14 = vcmp.eq.f32.partialorder %v2723_v55, 0.0  ;;  %v877_v49 = vrot.slane %v876_v22, 2 }
  0xa5   : > { %v940_v37 = vrot.slane %v939_v30, 4  ;;  %v1340_v38 = vand.u32 2147483648, %v2723_v55  ;;  %v1098_v42 = vrot.slane %v1097_v33, 1  ;;  %v1176_v44 = vrot.slane %v1175_v24, 2 }
  0xa6   : > { %v1020_v1 = vsel %vm831_vm0, %v982_v5, 0.0  ;;  %v1275_v4 = vand.u32 2147483648, %v2720_v39  ;;  %v2770_v34 = vadd.f32 1e-05, %v1045_v17  ;;  %v1062_v18 = vmul.f32 %v2757_v36, %v2757_v36 }
  0xa7   : > { %v1021_v46 = vrot.slane %v1020_v1, 4  ;;  %v1099_v28 = vadd.f32 %v1098_v42, %v1097_v33  ;;  %v1177_v3 = vadd.f32 %v1176_v44, %v1175_v24  ;;  %v1142_v14 = vmul.f32 %v2757_v36, %v2752_v29 }
  0xa8   : > { %v2780_v15 = vadd.f32 %v877_v49, %v876_v22  ;;  %v2782_v16 = vadd.f32 %v940_v37, %v939_v30  ;;  %v1100_v24 = vsel %vm831_vm0, %v1062_v18, 0.0  ;;  %v2183_v18 = vld [vmem:[%s2819_s22] ss:$0 sm:$0xff] }
  0xa9   : > { %v2246_v32 = vpop.eup %2245  ;;  %v1125_v17 = vmul.f32 0.25, %v1099_v28  ;;  %v1178_v22 = vrot.slane %v1177_v3, 1 }
  0xaa   : > { %v1401_v12 = vmul.f32 %v2246_v32, %v2653_v43  ;;  %v1417_v60 = vmul.f32 %v2246_v32, %v2659_v13  ;;  %v1433_v61 = vmul.f32 %v2246_v32, %v1425_v40  ;;  %v2248_v62 = vpop.eup %2247  ;;  %v2167_v40 = vld [vmem:[%s2789_s26] ss:$0 sm:$0xff] }
  0xab   : > { %v1271_v26 = vmul.f32 %v2248_v62, %v2720_v39  ;;  %v2811_v42 = vadd.f32 1e-05, %v1125_v17  ;;  %v1179_v44 = vadd.f32 %v1178_v22, %v1177_v3  ;;  %v1180_v22 = vsel %vm831_vm0, %v1142_v14, 0.0 }
  0xac   : > { %v2250_v6 = vpop.eup %2249  ;;  %v1441_v25 = vmul.f32 %v1401_v12, %v2487_v47  ;;  %v1449_v43 = vmul.f32 %v1433_v61, %v2489_v48  ;;  %v1465_v13 = vmul.f32 %v1433_v61, %v2487_v47  ;;  %v1473_v58 = vmul.f32 %v1417_v60, %v2489_v48 }
  0xad   : > { %v1336_v30 = vmul.f32 %v2250_v6, %v2723_v55  ;;  %v1022_v48 = vadd.f32 %v1021_v46, %v1020_v1  ;;  %v2252_v5 = vpop.eup %2251  ;;  %v1273_v37 = vsel %vm1272_vm11, %v2720_v39, %v1271_v26  ;;  %v2830_v62 = vmul.f32 0.25, %v1179_v44  ;;  %v2184_v44 = vld [vmem:[%s2819_s22 + $0x1] ss:$0 sm:$0xff] }
  0xae   : > { %v2800_v33 = vadd.f32 %v1449_v43, %v1441_v25  ;;  %v2802_v47 = vadd.f32 %v1473_v58, %v1465_v13  ;;  %v1402_v1 = vmul.f32 %v2252_v5, %v2737_v23  ;;  %v1418_v46 = vmul.f32 %v2252_v5, %v2741_v2  ;;  %v2841_v25 = vld [vmem:[%s2793_s21 + $0x1] ss:$0 sm:$0xff] }
  0xaf   : > { %v1338_v49 = vsel %vm1337_vm13, %v2723_v55, %v1336_v30  ;;  %v1434_v60 = vmul.f32 %v2252_v5, %v1426_v50  ;;  %v2828_v28 = vsel %vm1274_vm12, %v1275_v4, %v1273_v37  ;;  %v942_v39 = vrot.slane %v2782_v16, 2  ;;  %v2168_v4 = vld [vmem:[%s2789_s26 + $0x1] ss:$0 sm:$0xff]  ;;  %v2853_v30 = vld [vmem:[%s2457_s18 + $0x1c] sm:$0xf] }
  0xb0   : > { %v1545_v32 = vmul.f32 %v2167_v40, %v2800_v33  ;;  %v1609_v12 = vmul.f32 %v2796_v7, %v2802_v47  ;;  %v1341_v61 = vsel %vm1339_vm14, %v1340_v38, %v1338_v49  ;;  %v1442_v2 = vmul.f32 %v1402_v1, %v2499_v56 }
  0xb1   : > { %v1474_v3 = vmul.f32 %v1418_v46, %v2501_v57  ;;  %v1379_v6 = vmul.f32 %v1341_v61, %v2713_v53  ;;  %v1450_v21 = vmul.f32 %v1434_v60, %v2501_v57  ;;  %v1466_v50 = vmul.f32 %v1434_v60, %v2499_v56 }
  0xb2   : > { %v1617_v23 = vadd.f32 %v1609_v12, %v1545_v32  ;;  %v1308_v55 = vmul.f32 2.0, %v2828_v28  ;;  %v1023_v43 = vrot.slane %v1022_v48, 2  ;;  %v1101_v13 = vrot.slane %v1100_v24, 4 }
  0xb3   : > { %2253 = vrcp.f32 %v1379_v6  ;;  %v2843_v58 = vadd.f32 %v1450_v21, %v1442_v2  ;;  %v2845_v40 = vadd.f32 %v1474_v3, %v1466_v50  ;;  %v1221_v56 = vmul.f32 %v2811_v42, %v2770_v34 }
  0xb4   : > { %v1681_v38 = vadd.f32 %v2183_v18, %v1617_v23  ;;  %v2848_v57 = vadd.f32 %v1308_v55, %v2747_v20  ;;  %v1229_v17 = vmul.f32 %v2830_v62, %v2830_v62  ;;  %v1395_v49 = vadd.f32 %v2713_v53, %v2598_v0 }
  0xb5   : > { %v1546_v5 = vmul.f32 %v2168_v4, %v2843_v58  ;;  %v1610_v20 = vmul.f32 %v2841_v25, %v2845_v40  ;;  %v1411_v32 = vadd.f32 %v2713_v53, %v2593_v54  ;;  %v881_v1 = vsel %vm831_vm0, %v2853_v30, 0.0 }
  0xb6   : > { %vm1834_vm15 = vcmp.ge.f32.partialorder %v1681_v38, 0.0  ;;  %v1843_v26 = vmul.f32 %v2568_v35, %v1681_v38  ;;  %2255 = vrsqrt.f32 %v2848_v57  ;;  %v1237_v12 = vsub.f32 %v1221_v56, %v1229_v17 }
  0xb7   : > { %v1618_v14 = vadd.f32 %v1610_v20, %v1546_v5  ;;  %v1024_v46 = vadd.f32 %v1023_v43, %v1022_v48  ;;  %v1102_v18 = vadd.f32 %v1101_v13, %v1100_v24  ;;  %v1181_v60 = vrot.slane %v1180_v22, 4 }
  0xb8   : > { %v1851_v37 = vsel %vm1834_vm15, %v1681_v38, %v1843_v26  ;;  %vm1344_vm1 = vcmp.eq.f32.partialorder %v2848_v57, inf  ;;  %v2875_v0 = vmax.f32 %v1237_v12, 1e-12  ;;  %v879_v61 = vrot.slane %v2780_v15, 1 }
  0xb9   : > { %1883 = vst [vmem:[%s2871_s23] sm:$0xf] %v1851_v37  ;;  %v943_v54 = vadd.f32 %v942_v39, %v2782_v16  ;;  %v1682_v53 = vadd.f32 %v2184_v44, %v1618_v14  ;;  %v1025_v23 = vrot.slane %v1024_v46, 1  ;;  %v1103_v2 = vrot.slane %v1102_v18, 2 }
  0xba   : > { %v1182_v3 = vadd.f32 %v1181_v60, %v1180_v22  ;;  %vm1346_vm2 = vcmp.eq.f32.partialorder %v2848_v57, 0.0  ;;  %v1347_v6 = vand.u32 2147483648, %v2848_v57  ;;  %2257 = vrsqrt.f32 %v2875_v0 }
  0xbb   : > { %v882_v48 = vrot.slane %v881_v1, 4  ;;  %vm1835_vm3 = vcmp.ge.f32.partialorder %v1682_v53, 0.0  ;;  %v1844_v24 = vmul.f32 %v2568_v35, %v1682_v53  ;;  %v1026_v21 = vadd.f32 %v1025_v23, %v1024_v46  ;;  %v2169_v46 = vld [vmem:[%s2789_s26 + $0x2] ss:$0 sm:$0xff] }
  0xbc   : > { %v1104_v50 = vadd.f32 %v1103_v2, %v1102_v18  ;;  %vm1279_vm4 = vcmp.eq.f32.partialorder %v2875_v0, inf  ;;  %v1282_v16 = vand.u32 2147483648, %v2875_v0  ;;  %v1183_v39 = vrot.slane %v1182_v3, 2 }
  0xbd   : > { %v2254_v55 = vpop.eup %2253  ;;  %v880_v38 = vadd.f32 %v879_v61, %v2780_v15  ;;  %v944_v4 = vrot.slane %v943_v54, 1  ;;  %v1852_v43 = vsel %vm1835_vm3, %v1682_v53, %v1844_v24  ;;  %v1046_v17 = vmul.f32 0.25, %v1026_v21 }
  0xbe   : > { %v1403_v13 = vmul.f32 %v2254_v55, %v1395_v49  ;;  %v1419_v56 = vmul.f32 %v2254_v55, %v1411_v32  ;;  %v1435_v26 = vmul.f32 %v2254_v55, %v1427_v19  ;;  %1884 = vst [vmem:[%s2871_s23 + $0x4] sm:$0xf] %v1852_v43  ;;  %v1105_v22 = vrot.slane %v1104_v50, 1  ;;  %v2895_v49 = vld [vmem:[%s2793_s21 + $0x2] ss:$0 sm:$0xff] }
  0xbf   : > { %v1184_v5 = vadd.f32 %v1183_v39, %v1182_v3  ;;  %v895_v20 = vmul.f32 0.25, %v880_v38  ;;  %v883_v18 = vadd.f32 %v882_v48, %v881_v1  ;;  %v945_v53 = vadd.f32 %v944_v4, %v943_v54 }
  0xc0   : > { %v2256_v37 = vpop.eup %2255  ;;  %v1443_v44 = vmul.f32 %v1403_v13, %v2515_v10  ;;  %v1451_v12 = vmul.f32 %v1435_v26, %v2518_v11  ;;  %v1467_v15 = vmul.f32 %v1435_v26, %v2515_v10  ;;  %v1475_v14 = vmul.f32 %v1419_v56, %v2518_v11 }
  0xc1   : > { %v1343_v27 = vmul.f32 %v2256_v37, %v2848_v57  ;;  %v1106_v19 = vadd.f32 %v1105_v22, %v1104_v50  ;;  %v1185_v32 = vrot.slane %v1184_v5, 1  ;;  %v2903_v23 = vsub.f32 %v2702_v31, %v895_v20  ;;  %v2185_v31 = vld [vmem:[%s2819_s22 + $0x2] ss:$0 sm:$0xff] }
  0xc2   : > { %v2898_v60 = vadd.f32 %v1451_v12, %v1443_v44  ;;  %v2900_v61 = vadd.f32 %v1475_v14, %v1467_v15  ;;  %v2908_v11 = vadd.f32 1e-05, %v1046_v17  ;;  %v959_v54 = vmul.f32 0.25, %v945_v53 }
  0xc3   : > { %v1345_v10 = vsel %vm1344_vm1, %v2848_v57, %v1343_v27  ;;  %v1126_v2 = vmul.f32 0.25, %v1106_v19  ;;  %v1186_v3 = vadd.f32 %v1185_v32, %v1184_v5  ;;  %v983_v38 = vmul.f32 %v2903_v23, %v2903_v23 }
  0xc4   : > { %v1547_v24 = vmul.f32 %v2169_v46, %v2898_v60  ;;  %v1611_v1 = vmul.f32 %v2895_v49, %v2900_v61  ;;  %v1348_v48 = vsel %vm1346_vm2, %v1347_v6, %v1345_v10  ;;  %v2258_v21 = vpop.eup %2257  ;;  %vm1281_vm5 = vcmp.eq.f32.partialorder %v2875_v0, 0.0 }
  0xc5   : > { %v1380_v50 = vmul.f32 %v1348_v48, %v2828_v28  ;;  %v2917_v55 = vadd.f32 1e-05, %v1126_v2  ;;  %v2919_v39 = vmul.f32 0.25, %v1186_v3  ;;  %v1278_v43 = vmul.f32 %v2258_v21, %v2875_v0  ;;  %v2957_v3 = vld [vmem:[%s2457_s18 + $0x3c] sm:$0xf] }
  0xc6   : > { %v1619_v4 = vadd.f32 %v1611_v1, %v1547_v24  ;;  %v2926_v57 = vsub.f32 %v2726_v9, %v959_v54  ;;  %v884_v56 = vrot.slane %v883_v18, 2  ;;  %v1213_v17 = vadd.f32 %v2811_v42, %v2770_v34 }
  0xc7   : > { %2259 = vrcp.f32 %v1380_v50  ;;  %v1222_v6 = vmul.f32 %v2917_v55, %v2908_v11  ;;  %v1230_v13 = vmul.f32 %v2919_v39, %v2919_v39  ;;  %v1280_v22 = vsel %vm1279_vm4, %v2875_v0, %v1278_v43 }
  0xc8   : > { %v1683_v26 = vadd.f32 %v2185_v31, %v1619_v4  ;;  %v1027_v5 = vsel %vm831_vm0, %v983_v38, 0.0  ;;  %v2938_v9 = vsel %vm1281_vm5, %v1282_v16, %v1280_v22  ;;  %v1063_v44 = vmul.f32 %v2926_v57, %v2926_v57 }
  0xc9   : > { %v1238_v20 = vsub.f32 %v1222_v6, %v1230_v13  ;;  %v1028_v37 = vrot.slane %v1027_v5, 4  ;;  %v1309_v15 = vmul.f32 2.0, %v2938_v9  ;;  %v885_v27 = vadd.f32 %v884_v56, %v883_v18 }
  0xca   : > { %vm1836_vm6 = vcmp.ge.f32.partialorder %v1683_v26, 0.0  ;;  %v1845_v12 = vmul.f32 %v2568_v35, %v1683_v26  ;;  %v1107_v0 = vsel %vm831_vm0, %v1063_v44, 0.0  ;;  %v1143_v53 = vmul.f32 %v2926_v57, %v2903_v23 }
  0xcb   : > { %v2944_v14 = vmax.f32 %v1238_v20, 1e-12  ;;  %v1029_v46 = vadd.f32 %v1028_v37, %v1027_v5  ;;  %v2947_v16 = vadd.f32 %v1309_v15, %v1213_v17  ;;  %v1108_v32 = vrot.slane %v1107_v0, 4 }
  0xcc   : > { %v1853_v19 = vsel %vm1836_vm6, %v1683_v26, %v1845_v12  ;;  %v1396_v10 = vadd.f32 %v2828_v28, %v2687_v8  ;;  %v1428_v2 = vsub.f32 0.0, %v2677_v51  ;;  %v1412_v18 = vadd.f32 %v2828_v28, %v2675_v45 }
  0xcd   : > { %1885 = vst [vmem:[%s2871_s23 + $0x8] sm:$0xf] %v1853_v19  ;;  %2261 = vrsqrt.f32 %v2944_v14  ;;  %v2964_v24 = vadd.f32 %v2917_v55, %v2908_v11  ;;  %v1289_v1 = vand.u32 2147483648, %v2944_v14  ;;  %vm1286_vm7 = vcmp.eq.f32.partialorder %v2944_v14, inf }
  0xce   : > { %2263 = vrsqrt.f32 %v2947_v16  ;;  %v1030_v8 = vrot.slane %v1029_v46, 2  ;;  %v1109_v48 = vadd.f32 %v1108_v32, %v1107_v0  ;;  %v1187_v51 = vsel %vm831_vm0, %v1143_v53, 0.0  ;;  %v2981_v0 = vld [vmem:[%s2793_s21 + $0x3] ss:$0 sm:$0xff] }
  0xcf   : > { %v886_v54 = vrot.slane %v885_v27, 1  ;;  %vm1351_vm8 = vcmp.eq.f32.partialorder %v2947_v16, inf  ;;  %v1354_v21 = vand.u32 2147483648, %v2947_v16  ;;  %vm1288_vm9 = vcmp.eq.f32.partialorder %v2944_v14, 0.0 }
  0xd0   : > { %v1188_v45 = vrot.slane %v1187_v51, 4  ;;  %v946_v28 = vsel %vm831_vm0, %v2957_v3, 0.0  ;;  %vm1353_vm10 = vcmp.eq.f32.partialorder %v2947_v16, 0.0  ;;  %v1031_v50 = vadd.f32 %v1030_v8, %v1029_v46  ;;  %v2170_v46 = vld [vmem:[%s2789_s26 + $0x3] ss:$0 sm:$0xff] }
  0xd1   : > { %v2260_v31 = vpop.eup %2259  ;;  %v1110_v38 = vrot.slane %v1109_v48, 2  ;;  %v887_v4 = vadd.f32 %v886_v54, %v885_v27  ;;  %v947_v43 = vrot.slane %v946_v28, 4 }
  0xd2   : > { %v1404_v6 = vmul.f32 %v2260_v31, %v1396_v10  ;;  %v1420_v13 = vmul.f32 %v2260_v31, %v1412_v18  ;;  %v1436_v56 = vmul.f32 %v2260_v31, %v1428_v2  ;;  %v1189_v26 = vadd.f32 %v1188_v45, %v1187_v51  ;;  %v2191_v10 = vld [vmem:[%s2984_s24] ss:$0 sm:$0xff] }
  0xd3   : > { %v1032_v17 = vrot.slane %v1031_v50, 1  ;;  %v1111_v22 = vadd.f32 %v1110_v38, %v1109_v48  ;;  %v896_v5 = vmul.f32 0.25, %v887_v4  ;;  %v948_v20 = vadd.f32 %v947_v43, %v946_v28 }
  0xd4   : > { %v1444_v37 = vmul.f32 %v1404_v6, %v2572_v41  ;;  %v1452_v44 = vmul.f32 %v1436_v56, %v2603_v63  ;;  %v1468_v12 = vmul.f32 %v1436_v56, %v2572_v41  ;;  %v1476_v15 = vmul.f32 %v1420_v13, %v2603_v63 }
  0xd5   : > { %v1033_v27 = vadd.f32 %v1032_v17, %v1031_v50  ;;  %v1112_v19 = vrot.slane %v1111_v22, 1  ;;  %v1190_v32 = vrot.slane %v1189_v26, 2  ;;  %v949_v53 = vrot.slane %v948_v20, 2 }
  0xd6   : > { %v2987_v2 = vadd.f32 %v1452_v44, %v1444_v37  ;;  %v2989_v18 = vadd.f32 %v1476_v15, %v1468_v12  ;;  %v2992_v41 = vsub.f32 %v2853_v30, %v896_v5  ;;  %v1689_v63 = vmul.f32 %v2796_v7, %v2800_v33  ;;  %v2186_v30 = vld [vmem:[%s2819_s22 + $0x3] ss:$0 sm:$0xff] }
  0xd7   : > { %v2262_v8 = vpop.eup %2261  ;;  %v1047_v48 = vmul.f32 0.25, %v1033_v27  ;;  %v1113_v51 = vadd.f32 %v1112_v19, %v1111_v22  ;;  %v1191_v54 = vadd.f32 %v1190_v32, %v1189_v26  ;;  %v950_v45 = vadd.f32 %v949_v53, %v948_v20  ;;  %v2199_v53 = vld [vmem:[%s3035_s25] ss:$0 sm:$0xff] }
  0xd8   : > { %v2264_v28 = vpop.eup %2263  ;;  %v1548_v31 = vmul.f32 %v2170_v46, %v2987_v2  ;;  %v1612_v50 = vmul.f32 %v2981_v0, %v2989_v18  ;;  %v1285_v38 = vmul.f32 %v2262_v8, %v2944_v14  ;;  %v1753_v4 = vmul.f32 %v2191_v10, %v2802_v47  ;;  %v2192_v10 = vld [vmem:[%s2984_s24 + $0x1] ss:$0 sm:$0xff] }
  0xd9   : > { %v1350_v43 = vmul.f32 %v2264_v28, %v2947_v16  ;;  %v1127_v6 = vmul.f32 0.25, %v1113_v51  ;;  %v1192_v7 = vrot.slane %v1191_v54, 1  ;;  %v984_v33 = vmul.f32 %v2992_v41, %v2992_v41 }
  0xda   : > { %v1620_v13 = vadd.f32 %v1612_v50, %v1548_v31  ;;  %v1287_v56 = vsel %vm1286_vm7, %v2944_v14, %v1285_v38  ;;  %v3008_v26 = vadd.f32 1e-05, %v1047_v48  ;;  %v951_v17 = vrot.slane %v950_v45, 1  ;;  %v2193_v48 = vld [vmem:[%s2984_s24 + $0x2] ss:$0 sm:$0xff] }
  0xdb   : > { %v1352_v47 = vsel %vm1351_vm8, %v2947_v16, %v1350_v43  ;;  %v3015_v22 = vsel %vm1288_vm9, %v1289_v1, %v1287_v56  ;;  %v3017_v5 = vadd.f32 1e-05, %v1127_v6  ;;  %v1193_v20 = vadd.f32 %v1192_v7, %v1191_v54 }
  0xdc   : > { %v1684_v37 = vadd.f32 %v2186_v30, %v1620_v13  ;;  %v1355_v44 = vsel %vm1353_vm10, %v1354_v21, %v1352_v47  ;;  %v1310_v12 = vmul.f32 2.0, %v3015_v22  ;;  %v1034_v27 = vsel %vm831_vm0, %v984_v33, 0.0 }
  0xdd   : > { %v1381_v15 = vmul.f32 %v1355_v44, %v2938_v9  ;;  %v3023_v46 = vmul.f32 0.25, %v1193_v20  ;;  %v1761_v14 = vadd.f32 %v1753_v4, %v1689_v63  ;;  %v1223_v16 = vmul.f32 %v3017_v5, %v3008_v26 }
  0xde   : > { %vm1837_vm11 = vcmp.ge.f32.partialorder %v1684_v37, 0.0  ;;  %v1846_v1 = vmul.f32 %v2568_v35, %v1684_v37  ;;  %v3028_v19 = vadd.f32 %v1310_v12, %v2964_v24  ;;  %v952_v32 = vadd.f32 %v951_v17, %v950_v45 }
  0xdf   : > { %2265 = vrcp.f32 %v1381_v15  ;;  %v1231_v21 = vmul.f32 %v3023_v46, %v3023_v46  ;;  %v1397_v8 = vadd.f32 %v2938_v9, %v2811_v42  ;;  %v1429_v24 = vsub.f32 0.0, %v2830_v62 }
  0xe0   : > { %v1854_v63 = vsel %vm1837_vm11, %v1684_v37, %v1846_v1  ;;  %2267 = vrsqrt.f32 %v3028_v19  ;;  %v1413_v51 = vadd.f32 %v2938_v9, %v2770_v34  ;;  %v960_v45 = vmul.f32 0.25, %v952_v32 }
  0xe1   : > { %1886 = vst [vmem:[%s2871_s23 + $0xc] sm:$0xf] %v1854_v63  ;;  %v1239_v54 = vsub.f32 %v1223_v16, %v1231_v21  ;;  %v1035_v28 = vrot.slane %v1034_v27, 4  ;;  %v1825_v31 = vadd.f32 %v2199_v53, %v1761_v14  ;;  %v1690_v50 = vmul.f32 %v2841_v25, %v2843_v58 }
  0xe2   : > { %v1754_v42 = vmul.f32 %v2192_v10, %v2845_v40  ;;  %v1691_v62 = vmul.f32 %v2895_v49, %v2898_v60  ;;  %v3055_v4 = vsub.f32 %v2957_v3, %v960_v45  ;;  %v1755_v9 = vmul.f32 %v2193_v48, %v2900_v61  ;;  %v2200_v40 = vld [vmem:[%s3035_s25 + $0x1] ss:$0 sm:$0xff]  ;;  %v2194_v60 = vld [vmem:[%s2984_s24 + $0x3] ss:$0 sm:$0xff]  ;;  %v2171_v45 = vld [vmem:[%s2789_s26 + $0x4] ss:$0 sm:$0xff] }
  0xe3   : > { %v3052_v38 = vmax.f32 %v1239_v54, 1e-12  ;;  %v1036_v34 = vadd.f32 %v1035_v28, %v1034_v27  ;;  %v3060_v30 = vadd.f32 %v3017_v5, %v3008_v26  ;;  %vm1859_vm12 = vcmp.ge.f32.partialorder %v1825_v31, 0.0 }
  0xe4   : > { %v1867_v25 = vmul.f32 %v2568_v35, %v1825_v31  ;;  %v1762_v58 = vadd.f32 %v1754_v42, %v1690_v50  ;;  %vm1358_vm13 = vcmp.eq.f32.partialorder %v3028_v19, inf  ;;  %vm1360_vm14 = vcmp.eq.f32.partialorder %v3028_v19, 0.0 }
  0xe5   : > { %v1361_v49 = vand.u32 2147483648, %v3028_v19  ;;  %2269 = vrsqrt.f32 %v3052_v38  ;;  %v1037_v61 = vrot.slane %v1036_v34, 2  ;;  %v1064_v3 = vmul.f32 %v3055_v4, %v3055_v4 }
  0xe6   : > { %v1144_v43 = vmul.f32 %v3055_v4, %v2992_v41  ;;  %v1875_v6 = vsel %vm1859_vm12, %v1825_v31, %v1867_v25  ;;  %vm1293_vm15 = vcmp.eq.f32.partialorder %v3052_v38, inf  ;;  %v1826_v7 = vadd.f32 %v2200_v40, %v1762_v58 }
  0xe7   : > { %1891 = vst [vmem:[%s2871_s23 + $0x20] sm:$0xf] %v1875_v6  ;;  %v1763_v33 = vadd.f32 %v1755_v9, %v1691_v62  ;;  %v1692_v13 = vmul.f32 %v2981_v0, %v2987_v2  ;;  %vm1295_vm1 = vcmp.eq.f32.partialorder %v3052_v38, 0.0  ;;  %v1038_v56 = vadd.f32 %v1037_v61, %v1036_v34 }
  0xe8   : > { %v1114_v17 = vsel %vm831_vm0, %v1064_v3, 0.0  ;;  %v1194_v47 = vsel %vm831_vm0, %v1144_v43, 0.0  ;;  %v1756_v20 = vmul.f32 %v2194_v60, %v2989_v18  ;;  %vm1860_vm2 = vcmp.ge.f32.partialorder %v1826_v7, 0.0  ;;  %v2201_v18 = vld [vmem:[%s3035_s25 + $0x2] ss:$0 sm:$0xff] }
  0xe9   : > { %v2266_v37 = vpop.eup %2265  ;;  %v1115_v44 = vrot.slane %v1114_v17, 4  ;;  %v1195_v12 = vrot.slane %v1194_v47, 4  ;;  %v1868_v15 = vmul.f32 %v2568_v35, %v1826_v7  ;;  %v1039_v1 = vrot.slane %v1038_v56, 1  ;;  %v2187_v43 = vld [vmem:[%s2819_s22 + $0x4] ss:$0 sm:$0xff] }
  0xea   : > { %v2268_v27 = vpop.eup %2267  ;;  %v1405_v0 = vmul.f32 %v2266_v37, %v1397_v8  ;;  %v1421_v2 = vmul.f32 %v2266_v37, %v1413_v51  ;;  %v1437_v14 = vmul.f32 %v2266_v37, %v1429_v24  ;;  %v2179_v8 = vld [vmem:[%s2793_s21 + $0x4] ss:$0 sm:$0xff]  ;;  %v1827_v34 = vadd.f32 %v2201_v18, %v1763_v33 }
  0xeb   : > { %v1357_v16 = vmul.f32 %v2268_v27, %v3028_v19  ;;  %v1116_v21 = vadd.f32 %v1115_v44, %v1114_v17  ;;  %v1196_v32 = vadd.f32 %v1195_v12, %v1194_v47  ;;  %v1876_v53 = vsel %vm1860_vm2, %v1826_v7, %v1868_v15  ;;  %v2202_v17 = vld [vmem:[%s3035_s25 + $0x3] ss:$0 sm:$0xff]  ;;  %v2195_v12 = vld [vmem:[%s2984_s24 + $0x4] ss:$0 sm:$0xff] }
  0xec   : > { %v1445_v10 = vmul.f32 %v1405_v0, %v2666_v59  ;;  %v1453_v63 = vmul.f32 %v1437_v14, %v2680_v52  ;;  %v1469_v48 = vmul.f32 %v1437_v14, %v2666_v59  ;;  %v1477_v54 = vmul.f32 %v1421_v2, %v2680_v52  ;;  %1892 = vst [vmem:[%s2871_s23 + $0x24] sm:$0xf] %v1876_v53 }
  0xed   : > { %v1359_v24 = vsel %vm1358_vm13, %v3028_v19, %v1357_v16  ;;  %v1040_v51 = vadd.f32 %v1039_v1, %v1038_v56  ;;  %v1117_v28 = vrot.slane %v1116_v21, 2  ;;  %v1197_v31 = vrot.slane %v1196_v32, 2 }
  0xee   : > { %v1461_v50 = vadd.f32 %v1453_v63, %v1445_v10  ;;  %v1485_v42 = vadd.f32 %v1477_v54, %v1469_v48  ;;  %v1362_v62 = vsel %vm1360_vm14, %v1361_v49, %v1359_v24  ;;  %v1296_v9 = vand.u32 2147483648, %v3052_v38 }
  0xef   : > { %v2270_v59 = vpop.eup %2269  ;;  %v1382_v52 = vmul.f32 %v1362_v62, %v3015_v22  ;;  %v1118_v25 = vadd.f32 %v1117_v28, %v1116_v21  ;;  %v1198_v58 = vadd.f32 %v1197_v31, %v1196_v32  ;;  %v1048_v3 = vmul.f32 0.25, %v1040_v51 }
  0xf0   : > { %v1549_v40 = vmul.f32 %v2171_v45, %v1461_v50  ;;  %v1613_v60 = vmul.f32 %v2179_v8, %v1485_v42  ;;  %v1292_v61 = vmul.f32 %v2270_v59, %v3052_v38  ;;  %vm1861_vm0 = vcmp.ge.f32.partialorder %v1827_v34, 0.0  ;;  %v2172_v59 = vld [vmem:[%s2789_s26 + $0x5] ss:$0 sm:$0xff] }
  0xf1   : > { %2271 = vrcp.f32 %v1382_v52  ;;  %v1119_v6 = vrot.slane %v1118_v25, 1  ;;  %v1199_v19 = vrot.slane %v1198_v58, 1  ;;  %v1869_v33 = vmul.f32 %v2568_v35, %v1827_v34  ;;  %v2180_v52 = vld [vmem:[%s2793_s21 + $0x5] ss:$0 sm:$0xff] }
  0xf2   : > { %v1621_v49 = vadd.f32 %v1613_v60, %v1549_v40  ;;  %v1294_v7 = vsel %vm1293_vm15, %v3052_v38, %v1292_v61  ;;  %v1764_v56 = vadd.f32 %v1756_v20, %v1692_v13  ;;  %v3111_v0 = vadd.f32 1e-05, %v1048_v3  ;;  %v2196_v40 = vld [vmem:[%s2984_s24 + $0x5] ss:$0 sm:$0xff] }
  0xf3   : > { %v3107_v47 = vsel %vm1295_vm1, %v1296_v9, %v1294_v7  ;;  %v1120_v37 = vadd.f32 %v1119_v6, %v1118_v25  ;;  %v1200_v44 = vadd.f32 %v1199_v19, %v1198_v58  ;;  %v1693_v2 = vmul.f32 %v2179_v8, %v1461_v50 }
  0xf4   : > { %v1685_v15 = vadd.f32 %v2187_v43, %v1621_v49  ;;  %v1311_v27 = vmul.f32 2.0, %v3107_v47  ;;  %v1877_v13 = vsel %vm1861_vm0, %v1827_v34, %v1869_v33  ;;  %v1828_v20 = vadd.f32 %v2202_v17, %v1764_v56  ;;  %v2204_v33 = vld [vmem:[%s3035_s25 + $0x5] ss:$0 sm:$0xff] }
  0xf5   : > { %v1128_v14 = vmul.f32 0.25, %v1120_v37  ;;  %v3113_v1 = vmul.f32 0.25, %v1200_v44  ;;  %1893 = vst [vmem:[%s2871_s23 + $0x28] sm:$0xf] %v1877_v13  ;;  %v1757_v21 = vmul.f32 %v2195_v12, %v1485_v42  ;;  %v1398_v32 = vadd.f32 %v3015_v22, %v2917_v55 }
  0xf6   : > { %vm1838_vm3 = vcmp.ge.f32.partialorder %v1685_v15, 0.0  ;;  %v1847_v38 = vmul.f32 %v2568_v35, %v1685_v15  ;;  %v1319_v16 = vadd.f32 %v1311_v27, %v3060_v30  ;;  %v1430_v53 = vsub.f32 0.0, %v2919_v39  ;;  %v2203_v39 = vld [vmem:[%s3035_s25 + $0x4] ss:$0 sm:$0xff] }
  0xf7   : > { %v3122_v18 = vadd.f32 1e-05, %v1128_v14  ;;  %v1232_v10 = vmul.f32 %v3113_v1, %v3113_v1  ;;  %v1414_v48 = vadd.f32 %v3015_v22, %v2908_v11  ;;  %vm1862_vm4 = vcmp.ge.f32.partialorder %v1828_v20, 0.0 }
  0xf8   : > { %v1855_v63 = vsel %vm1838_vm3, %v1685_v15, %v1847_v38  ;;  %2273 = vrsqrt.f32 %v1319_v16  ;;  %v1870_v55 = vmul.f32 %v2568_v35, %v1828_v20  ;;  %v1765_v54 = vadd.f32 %v1757_v21, %v1693_v2 }
  0xf9   : > { %1887 = vst [vmem:[%s2871_s23 + $0x10] sm:$0xf] %v1855_v63  ;;  %v1224_v30 = vmul.f32 %v3122_v18, %v3111_v0  ;;  %vm1365_vm6 = vcmp.eq.f32.partialorder %v1319_v16, inf  ;;  %v1368_v60 = vand.u32 2147483648, %v1319_v16  ;;  %vm1367_vm7 = vcmp.eq.f32.partialorder %v1319_v16, 0.0 }
  0xfa   : > { %v1878_v24 = vsel %vm1862_vm4, %v1828_v20, %v1870_v55  ;;  %v1829_v11 = vadd.f32 %v2203_v39, %v1765_v54  ;;  %v1216_v21 = vadd.f32 %v3122_v18, %v3111_v0  ;;  %v1399_v63 = vadd.f32 %v3107_v47, %v3017_v5 }
  0xfb   : > { %v2272_v45 = vpop.eup %2271  ;;  %v1240_v8 = vsub.f32 %v1224_v30, %v1232_v10  ;;  %1894 = vst [vmem:[%s2871_s23 + $0x2c] sm:$0xf] %v1878_v24  ;;  %v1431_v30 = vsub.f32 0.0, %v3023_v46 }
  0xfc   : > { %v1406_v51 = vmul.f32 %v2272_v45, %v1398_v32  ;;  %v1422_v28 = vmul.f32 %v2272_v45, %v1414_v48  ;;  %v1438_v31 = vmul.f32 %v2272_v45, %v1430_v53  ;;  %vm1863_vm5 = vcmp.ge.f32.partialorder %v1829_v11, 0.0 }
  0xfd   : > { %v1248_v22 = vmax.f32 %v1240_v8, 1e-12  ;;  %v1871_v58 = vmul.f32 %v2568_v35, %v1829_v11  ;;  %v1415_v48 = vadd.f32 %v3107_v47, %v3008_v26  ;;  %v2181_v26 = vld [vmem:[%s2793_s21 + $0x6] ss:$0 sm:$0xff] }
  0xfe   : > { %v1446_v50 = vmul.f32 %v1406_v51, %v2752_v29  ;;  %v1454_v42 = vmul.f32 %v1438_v31, %v2757_v36  ;;  %v1470_v62 = vmul.f32 %v1438_v31, %v2752_v29  ;;  %v1478_v34 = vmul.f32 %v1422_v28, %v2757_v36  ;;  %v2188_v36 = vld [vmem:[%s2819_s22 + $0x5] ss:$0 sm:$0xff]  ;;  %v2173_v31 = vld [vmem:[%s2789_s26 + $0x6] ss:$0 sm:$0xff] }
  0xff   : > { %2275 = vrsqrt.f32 %v1248_v22  ;;  %v1879_v29 = vsel %vm1863_vm5, %v1829_v11, %v1871_v58  ;;  %vm1300_vm9 = vcmp.eq.f32.partialorder %v1248_v22, inf  ;;  %v1303_v14 = vand.u32 2147483648, %v1248_v22 }
 0x100   : > { %v1462_v9 = vadd.f32 %v1454_v42, %v1446_v50  ;;  %v1486_v25 = vadd.f32 %v1478_v34, %v1470_v62  ;;  %1895 = vst [vmem:[%s2871_s23 + $0x30] sm:$0xf] %v1879_v29  ;;  %vm1302_vm11 = vcmp.eq.f32.partialorder %v1248_v22, 0.0  ;;  %v2189_v34 = vld [vmem:[%s2819_s22 + $0x6] ss:$0 sm:$0xff] }
 0x102   : > { %v2274_v61 = vpop.eup %2273  ;;  %v1550_v3 = vmul.f32 %v2172_v59, %v1462_v9  ;;  %v1614_v43 = vmul.f32 %v2180_v52, %v1486_v25  ;;  %v1694_v6 = vmul.f32 %v2180_v52, %v1462_v9  ;;  %v1758_v49 = vmul.f32 %v2196_v40, %v1486_v25  ;;  %v2205_v59 = vld [vmem:[%s3035_s25 + $0x6] ss:$0 sm:$0xff] }
 0x103   : > { %v1364_v19 = vmul.f32 %v2274_v61, %v1319_v16 }
 0x104   : > { %v1622_v7 = vadd.f32 %v1614_v43, %v1550_v3  ;;  %v1766_v17 = vadd.f32 %v1758_v49, %v1694_v6 }
 0x105   : > { %v1366_v56 = vsel %vm1365_vm6, %v1319_v16, %v1364_v19 }
 0x106   : > { %v1686_v37 = vadd.f32 %v2188_v36, %v1622_v7  ;;  %v1369_v44 = vsel %vm1367_vm7, %v1368_v60, %v1366_v56  ;;  %v1830_v15 = vadd.f32 %v2204_v33, %v1766_v17  ;;  %v1432_v7 = vsub.f32 0.0, %v3113_v1 }
 0x107   : > { %v1383_v12 = vmul.f32 %v1369_v44, %v3107_v47  ;;  %v2197_v47 = vld [vmem:[%s2984_s24 + $0x6] ss:$0 sm:$0xff] }
 0x108   : > { %vm1839_vm8 = vcmp.ge.f32.partialorder %v1686_v37, 0.0  ;;  %v1848_v27 = vmul.f32 %v2568_v35, %v1686_v37  ;;  %vm1864_vm10 = vcmp.ge.f32.partialorder %v1830_v15, 0.0  ;;  %v1872_v13 = vmul.f32 %v2568_v35, %v1830_v15 }
 0x109   : > { %v2276_v2 = vpop.eup %2275  ;;  %2277 = vrcp.f32 %v1383_v12 }
 0x10a   : > { %v1856_v20 = vsel %vm1839_vm8, %v1686_v37, %v1848_v27  ;;  %v1299_v38 = vmul.f32 %v2276_v2, %v1248_v22  ;;  %v1880_v16 = vsel %vm1864_vm10, %v1830_v15, %v1872_v13  ;;  %v2174_v2 = vld [vmem:[%s2789_s26 + $0x7] ss:$0 sm:$0xff] }
 0x10b   : > { %1888 = vst [vmem:[%s2871_s23 + $0x14] sm:$0xf] %v1856_v20  ;;  %1896 = vst [vmem:[%s2871_s23 + $0x34] sm:$0xf] %v1880_v16 }
 0x10c   : > { %v1301_v32 = vsel %vm1300_vm9, %v1248_v22, %v1299_v38 }
 0x10d   : > { %v1304_v53 = vsel %vm1302_vm11, %v1303_v14, %v1301_v32  ;;  %v2198_v14 = vld [vmem:[%s2984_s24 + $0x7] ss:$0 sm:$0xff] }
 0x10e   : > { %v1312_v10 = vmul.f32 2.0, %v1304_v53  ;;  %v1400_v19 = vadd.f32 %v1304_v53, %v3122_v18  ;;  %v1416_v49 = vadd.f32 %v1304_v53, %v3111_v0  ;;  %v2182_v18 = vld [vmem:[%s2793_s21 + $0x7] ss:$0 sm:$0xff]  ;;  %v2206_v32 = vld [vmem:[%s3035_s25 + $0x7] ss:$0 sm:$0xff] }
 0x110   : > { %v1320_v55 = vadd.f32 %v1312_v10, %v1216_v21  ;;  %v2190_v21 = vld [vmem:[%s2819_s22 + $0x7] ss:$0 sm:$0xff] }
 0x112   : > { %2279 = vrsqrt.f32 %v1320_v55  ;;  %vm1372_vm12 = vcmp.eq.f32.partialorder %v1320_v55, inf  ;;  %v1375_v25 = vand.u32 2147483648, %v1320_v55  ;;  %vm1374_vm13 = vcmp.eq.f32.partialorder %v1320_v55, 0.0 }
 0x113   : > { %v2278_v39 = vpop.eup %2277 }
 0x114   : > { %v1407_v54 = vmul.f32 %v2278_v39, %v1399_v63  ;;  %v1423_v45 = vmul.f32 %v2278_v39, %v1415_v48  ;;  %v1439_v8 = vmul.f32 %v2278_v39, %v1431_v30  ;;  %v1923_v39 = vld [vmem:[%s2871_s23] sm:$0xf] (%p2384_p5) }
 0x115   : > { %1924 = vst [vmem:[%s1907_s13] sm:$0xf] (%p2384_p5), %v1923_v39 }
 0x116   : > { %v1447_v24 = vmul.f32 %v1407_v54, %v2903_v23  ;;  %v1455_v51 = vmul.f32 %v1439_v8, %v2926_v57  ;;  %v1471_v28 = vmul.f32 %v1439_v8, %v2903_v23  ;;  %v1479_v5 = vmul.f32 %v1423_v45, %v2926_v57  ;;  %v1927_v54 = vld [vmem:[%s2871_s23 + $0x8] sm:$0xf] (%p2384_p5)  ;;  %v1929_v45 = vld [vmem:[%s2871_s23 + $0xc] sm:$0xf] (%p2384_p5)  ;;  %v1931_v8 = vld [vmem:[%s2871_s23 + $0x10] sm:$0xf] (%p2384_p5) }
 0x117   : > { %1928 = vst [vmem:[%s1907_s13 + $0x10] sm:$0xf] (%p2384_p5), %v1927_v54  ;;  %1930 = vst [vmem:[%s1907_s13 + $0x18] sm:$0xf] (%p2384_p5), %v1929_v45 }
 0x118   : > { %v1463_v46 = vadd.f32 %v1455_v51, %v1447_v24  ;;  %v1487_v11 = vadd.f32 %v1479_v5, %v1471_v28  ;;  %1932 = vst [vmem:[%s1907_s13 + $0x20] sm:$0xf] (%p2384_p5), %v1931_v8  ;;  %v1933_v24 = vld [vmem:[%s2871_s23 + $0x14] sm:$0xf] (%p2384_p5)  ;;  %v1939_v5 = vld [vmem:[%s2871_s23 + $0x20] sm:$0xf] (%p2384_p5) }
 0x119   : > { %1934 = vst [vmem:[%s1907_s13 + $0x28] sm:$0xf] (%p2384_p5), %v1933_v24  ;;  %1940 = vst [vmem:[%s1907_s13 + $0x40] sm:$0xf] (%p2384_p5), %v1939_v5 }
 0x11a   : > { %v1551_v22 = vmul.f32 %v2173_v31, %v1463_v46  ;;  %v1615_v50 = vmul.f32 %v2181_v26, %v1487_v11  ;;  %v1695_v42 = vmul.f32 %v2181_v26, %v1463_v46  ;;  %v1759_v62 = vmul.f32 %v2197_v47, %v1487_v11  ;;  %v1941_v31 = vld [vmem:[%s2871_s23 + $0x24] sm:$0xf] (%p2384_p5)  ;;  %v1943_v26 = vld [vmem:[%s2871_s23 + $0x28] sm:$0xf] (%p2384_p5)  ;;  %v1945_v47 = vld [vmem:[%s2871_s23 + $0x2c] sm:$0xf] (%p2384_p5) }
 0x11b   : > { %1942 = vst [vmem:[%s1907_s13 + $0x48] sm:$0xf] (%p2384_p5), %v1941_v31  ;;  %1944 = vst [vmem:[%s1907_s13 + $0x50] sm:$0xf] (%p2384_p5), %v1943_v26  ;;  %v1947_v46 = vld [vmem:[%s2871_s23 + $0x30] sm:$0xf] (%p2384_p5) }
 0x11c   : > { %v2280_v52 = vpop.eup %2279  ;;  %v1623_v9 = vadd.f32 %v1615_v50, %v1551_v22  ;;  %v1767_v58 = vadd.f32 %v1759_v62, %v1695_v42  ;;  %v1949_v11 = vld [vmem:[%s2871_s23 + $0x34] sm:$0xf] (%p2384_p5)  ;;  %1946 = vst [vmem:[%s1907_s13 + $0x58] sm:$0xf] (%p2384_p5), %v1945_v47  ;;  %1948 = vst [vmem:[%s1907_s13 + $0x60] sm:$0xf] (%p2384_p5), %v1947_v46 }
 0x11d   : > { %v1371_v23 = vmul.f32 %v2280_v52, %v1320_v55  ;;  %1950 = vst [vmem:[%s1907_s13 + $0x68] sm:$0xf] (%p2384_p5), %v1949_v11 }
 0x11e   : > { %v1687_v57 = vadd.f32 %v2189_v34, %v1623_v9  ;;  %v1831_v40 = vadd.f32 %v2205_v59, %v1767_v58 }
 0x11f   : > { %v1373_v60 = vsel %vm1372_vm12, %v1320_v55, %v1371_v23 }
 0x120   : > { %vm1840_vm14 = vcmp.ge.f32.partialorder %v1687_v57, 0.0  ;;  %v1849_v61 = vmul.f32 %v2568_v35, %v1687_v57  ;;  %v1376_v3 = vsel %vm1374_vm13, %v1375_v25, %v1373_v60  ;;  %vm1865_vm15 = vcmp.ge.f32.partialorder %v1831_v40, 0.0 }
 0x121   : > { %v1384_v43 = vmul.f32 %v1376_v3, %v1304_v53  ;;  %v1873_v29 = vmul.f32 %v2568_v35, %v1831_v40 }
 0x122   : > { %v1857_v6 = vsel %vm1840_vm14, %v1687_v57, %v1849_v61 }
 0x123   : > { %1889 = vst [vmem:[%s2871_s23 + $0x18] sm:$0xf] %v1857_v6  ;;  %2281 = vrcp.f32 %v1384_v43  ;;  %v1881_v36 = vsel %vm1865_vm15, %v1831_v40, %v1873_v29 }
 0x124   : > { %1897 = vst [vmem:[%s2871_s23 + $0x38] sm:$0xf] %v1881_v36 }
 0x12a   : > { %v1935_v51 = vld [vmem:[%s2871_s23 + $0x18] sm:$0xf] (%p2384_p5) }
 0x12b   : > { %1936 = vst [vmem:[%s1907_s13 + $0x30] sm:$0xf] (%p2384_p5), %v1935_v51  ;;  %v1951_v22 = vld [vmem:[%s2871_s23 + $0x38] sm:$0xf] (%p2384_p5) }
 0x12c   : > { %1952 = vst [vmem:[%s1907_s13 + $0x70] sm:$0xf] (%p2384_p5), %v1951_v22 }
 0x12d   : > { %v2282_v33 = vpop.eup %2281 }
 0x12e   : > { %v1408_v56 = vmul.f32 %v2282_v33, %v1400_v19  ;;  %v1424_v17 = vmul.f32 %v2282_v33, %v1416_v49  ;;  %v1440_v37 = vmul.f32 %v2282_v33, %v1432_v7 }
 0x130   : > { %v1448_v44 = vmul.f32 %v1408_v56, %v2992_v41  ;;  %v1456_v12 = vmul.f32 %v1440_v37, %v3055_v4  ;;  %v1472_v15 = vmul.f32 %v1440_v37, %v2992_v41  ;;  %v1480_v27 = vmul.f32 %v1424_v17, %v3055_v4 }
 0x132   : > { %v1464_v0 = vadd.f32 %v1456_v12, %v1448_v44  ;;  %v1488_v13 = vadd.f32 %v1480_v27, %v1472_v15 }
 0x134   : > { %v1552_v1 = vmul.f32 %v2174_v2, %v1464_v0  ;;  %v1616_v20 = vmul.f32 %v2182_v18, %v1488_v13  ;;  %v1696_v38 = vmul.f32 %v2182_v18, %v1464_v0  ;;  %v1760_v16 = vmul.f32 %v2198_v14, %v1488_v13 }
 0x136   : > { %v1624_v53 = vadd.f32 %v1616_v20, %v1552_v1  ;;  %v1768_v10 = vadd.f32 %v1760_v16, %v1696_v38 }
 0x137   : > { %1905 = sbr.rel (!%p2384_p5) target bundleno = 327 (0x147), region = 298 }
 0x138   : > { %v1688_v63 = vadd.f32 %v2190_v21, %v1624_v53  ;;  %v1832_v48 = vadd.f32 %v2206_v32, %v1768_v10 }
 0x13a   : > { %vm1841_vm1 = vcmp.ge.f32.partialorder %v1688_v63, 0.0  ;;  %v1850_v41 = vmul.f32 %v2568_v35, %v1688_v63  ;;  %vm1866_vm2 = vcmp.ge.f32.partialorder %v1832_v48, 0.0  ;;  %v1874_v4 = vmul.f32 %v2568_v35, %v1832_v48  ;;  %v1925_v35 = vld [vmem:[%s2871_s23 + $0x4] sm:$0xf] (%p2384_p5) }
 0x13b   : > { %1926 = vst [vmem:[%s1907_s13 + $0x8] sm:$0xf] (%p2384_p5), %v1925_v35 }
 0x13c   : > { %v1858_v30 = vsel %vm1841_vm1, %v1688_v63, %v1850_v41  ;;  %v1882_v55 = vsel %vm1866_vm2, %v1832_v48, %v1874_v4 }
 0x13d   : > { %1890 = vst [vmem:[%s2871_s23 + $0x1c] sm:$0xf] %v1858_v30  ;;  %1898 = vst [vmem:[%s2871_s23 + $0x3c] sm:$0xf] %v1882_v55 }
 0x144   : > { %v1937_v28 = vld [vmem:[%s2871_s23 + $0x1c] sm:$0xf] }
 0x145   : > { %1938 = vst [vmem:[%s1907_s13 + $0x38] sm:$0xf] %v1937_v28  ;;  %v1953_v50 = vld [vmem:[%s2871_s23 + $0x3c] sm:$0xf] }
 0x146   : > { %1954 = vst [vmem:[%s1907_s13 + $0x78] sm:$0xf] %v1953_v50 }
 0x147 PF: > { %p15_p10 = scmp.ge.s32.totalorder %s2367_s29, 4   ;;  %s3229_s26 = smov %s2301_s27 }
 0x148   : > { %s3230_s27 = smov %s2378_s9  ;;  %s3231_s28 = smov %s2367_s29 }
 0x149   :  { %17 = sbr.rel (!%p15_p10) target bundleno = 4 (0x4), region = 410 }

</bundles_post_ra>
